<compile_context>
chip_gen: v7x
topology: tpu7x:2x2x1
jax: 0.10.0
libtpu: 0.0.40
codegen_flags: <defaults>
</compile_context>

<pallas_src>
import functools

import jax
import jax.numpy as jnp
from jax.experimental import pallas as pl
from jax.experimental.pallas import tpu as pltpu


def _round_up(x, m):
    return ((x + m - 1) // m) * m


def _buf_bytes(shape, itemsize):
    """VMEM footprint of a buffer, honoring (sublane, 128)-lane tile padding."""
    sublane = max(8, 8 * (4 // itemsize))   # f32:8, bf16:16, int8/fp8:32
    lead = 1
    for d in shape[:-2]:
        lead *= int(d)
    r, c = int(shape[-2]), int(shape[-1])
    return lead * _round_up(r, sublane) * _round_up(c, 128) * itemsize


def _vmem_capacity_bytes():
    try:
        return int(pltpu.get_tpu_info().vmem_capacity_bytes)
    except Exception:
        pass
    try:
        kind = jax.devices()[0].device_kind.lower()
        if "v7" in kind or "7x" in kind:
            return 64 * 1024 * 1024
        return 128 * 1024 * 1024
    except Exception:
        return 64 * 1024 * 1024   # conservative (v7x-sized)


def _mhsa_kernel(x_ref, w1t_ref, w2t_ref, out_ref, attn_ref, *, valid_t):
    # x_ref:   (Bb, T_pad, d_in)    batch-block of inputs (native dtype)
    # w1t_ref: (d_in, d_hidden)     W1.T  (so x @ w1t == W1(x) in torch terms)
    # w2t_ref: (d_hidden, n_head)   W2.T
    # out_ref: (Bb, n_head, d_in)
    # attn_ref:(Bb, T_pad, n_head)
    bb, t_pad, d_in = x_ref.shape
    n_head = w2t_ref.shape[1]

    # Projections on the flattened (Bb*T_pad, d_in) operand (fills the MXU M
    # dimension); T_pad is a multiple of the dtype sublane so the reshape is
    # layout-trivial.  Native-dtype operands, f32 accumulation.
    x2 = x_ref[...].reshape(bb * t_pad, d_in)
    h = jnp.tanh(jnp.dot(x2, w1t_ref[...],
                         preferred_element_type=jnp.float32))        # f32
    logits = jnp.dot(h.astype(x_ref.dtype), w2t_ref[...],
                     preferred_element_type=jnp.float32)              # f32
    logits = logits.reshape(bb, t_pad, n_head)

    if valid_t != t_pad:
        # Mask padded sequence rows so they do not contribute to the softmax.
        pad_mask = jax.lax.broadcasted_iota(
            jnp.int32, (bb, t_pad, n_head), 1) >= valid_t
        logits = jnp.where(pad_mask, jnp.float32(-1e30), logits)

    # softmax over the sequence axis (torch nn.Softmax(dim=1))
    m = jnp.max(logits, axis=1, keepdims=True)
    e = jnp.exp(logits - m)
    denom = jnp.sum(e, axis=1, keepdims=True)
    attn = e * pl.reciprocal(denom, approx=False)     # (Bb, T_pad, n_head) f32

    attn_ref[...] = attn.astype(attn_ref.dtype)

    # output[b] = attn[b]^T @ x[b]: batched contracting-dim dot_general.
    # Re-read x_ref here (rather than holding the big x block in vregs across
    # tanh/softmax) to keep the vreg live range short and avoid spills.
    out = jax.lax.dot_general(
        attn.astype(x_ref.dtype), x_ref[...],
        dimension_numbers=(((1,), (1,)), ((0,), (0,))),
        preferred_element_type=jnp.float32)           # (Bb, n_head, d_in)
    out_ref[...] = out.astype(out_ref.dtype)


def multi_head_self_attention(x, w1, w2):
    """x: (B, T, d_in); w1: (d_hidden, d_in); w2: (n_head, d_hidden).

    Returns (output, attn) with output (B, n_head, d_in) (squeezed to (B, d_in)
    if n_head == 1) and attn (B, T, n_head), matching the PyTorch module.
    For bf16 inputs, attn/output are returned in bf16 (lower precision than the
    f32 torch reference).
    """
    B, T, d_in = x.shape
    d_hidden = w1.shape[0]
    n_head = w2.shape[0]
    dtype = x.dtype
    itemsize = jnp.dtype(dtype).itemsize

    # Pre-transpose weights (wrapper-side glue) so the kernel does plain
    # row-major matmuls.
    w1t = jnp.asarray(w1, dtype).T       # (d_in, d_hidden)
    w2t = jnp.asarray(w2, dtype).T       # (d_hidden, n_head)

    # dtype-correct sublane padding of T (8 f32 / 16 bf16 / 32 int8).
    sublane = max(8, 8 * (4 // itemsize))
    t_pad = _round_up(T, sublane)

    # --- generation-aware budgets -------------------------------------------
    vmem_cap = _vmem_capacity_bytes()
    small_vmem = vmem_cap <= 80 * 1024 * 1024          # v7x-class (64 MiB / TC)
    if small_vmem:
        vmem_limit = min(48 * 1024 * 1024, vmem_cap)
        step_budget = 14 * 1024 * 1024
        rows_target = 512
    else:                                               # v5e / v6e (128 MiB)
        vmem_limit = 96 * 1024 * 1024
        step_budget = 32 * 1024 * 1024
        rows_target = 1024

    def _step_bytes(b):
        # Pipelined blocks (conservatively count weights double-buffered too).
        xb = 2 * _buf_bytes((b, t_pad, d_in), itemsize)
        w1b = 2 * _buf_bytes((d_in, d_hidden), itemsize)
        w2b = 2 * _buf_bytes((d_hidden, n_head), itemsize)
        ob = 2 * _buf_bytes((b, n_head, d_in), itemsize)
        ab = 2 * _buf_bytes((b, t_pad, n_head), itemsize)
        # f32 intermediates (lane-padded: n_head / d_hidden rounded to 128).
        f32h = _buf_bytes((b * t_pad, d_hidden), 4)
        f32a = 3 * _buf_bytes((b, t_pad, n_head), 4)
        f32o = _buf_bytes((b, n_head, d_in), 4)
        return xb + w1b + w2b + ob + ab + f32h + f32a + f32o

    # --- batch-block size: a divisor of B (no batch padding / extra HBM pass)
    bb_cap = max(1, rows_target // t_pad)
    if small_vmem and B >= 4:
        # keep >= 4 grid steps (>= 2 per TensorCore) on v7x for DMA overlap
        bb_cap = min(bb_cap, max(1, B // 4))
    bb = 1
    for d in range(1, B + 1):
        if B % d == 0 and d <= bb_cap and _step_bytes(d) <= step_budget:
            bb = d
    grid = (B // bb,)

    xp = x
    if t_pad != T:
        xp = jnp.pad(x, ((0, 0), (0, t_pad - T), (0, 0)))

    kernel = functools.partial(_mhsa_kernel, valid_t=T)

    def _run(single_buffer_weights):
        # Weights are never re-fetched (constant index_map); single-buffer them
        # to free VMEM.  Fall back to default buffering if unsupported.
        w_kw = {"pipeline_mode": pl.Buffered(1)} if single_buffer_weights else {}
        return pl.pallas_call(
            kernel,
            out_shape=(
                jax.ShapeDtypeStruct((B, n_head, d_in), dtype),
                jax.ShapeDtypeStruct((B, t_pad, n_head), dtype),
            ),
            grid_spec=pltpu.PrefetchScalarGridSpec(
                num_scalar_prefetch=0,
                grid=grid,
                in_specs=[
                    pl.BlockSpec((bb, t_pad, d_in), lambda i: (i, 0, 0)),
                    pl.BlockSpec((d_in, d_hidden), lambda i: (0, 0), **w_kw),
                    pl.BlockSpec((d_hidden, n_head), lambda i: (0, 0), **w_kw),
                ],
                out_specs=[
                    pl.BlockSpec((bb, n_head, d_in), lambda i: (i, 0, 0)),
                    pl.BlockSpec((bb, t_pad, n_head), lambda i: (i, 0, 0)),
                ],
            ),
            compiler_params=pltpu.CompilerParams(
                dimension_semantics=("parallel",),
                vmem_limit_bytes=vmem_limit,
            ),
        )(xp, w1t, w2t)

    try:
        out, attn = _run(True)
    except Exception:
        out, attn = _run(False)

    if t_pad != T:
        attn = attn[:, :T]
    if n_head == 1:
        out = jnp.squeeze(out, axis=1)
    return out, attn


def _xavier_uniform(key, fan_out, fan_in, dtype=jnp.float32):
    # matches torch.nn.init.xavier_uniform_ for a (fan_out, fan_in) Linear weight
    limit = (6.0 / (fan_in + fan_out)) ** 0.5
    return jax.random.uniform(key, (fan_out, fan_in), dtype=dtype,
                              minval=-limit, maxval=limit)


def _reference(x, w1, w2):
    h = jnp.tanh(jnp.einsum('btd,hd->bth', x, w1))
    logits = jnp.einsum('bth,nh->btn', h, w2)
    attn = jax.nn.softmax(logits, axis=1)
    out = jnp.einsum('btn,btd->bnd', attn, x)
    if out.shape[1] == 1:
        out = jnp.squeeze(out, axis=1)
    return out, attn


if __name__ == "__main__":
    key = jax.random.PRNGKey(0)

    configs = [
        # (B, T, d_in, d_hidden, n_head, dtype, tol)
        (16, 8, 32, 16, 4, jnp.float32, 1e-5),   # batch-blocked, no padding
        (3,  8, 32, 16, 1, jnp.float32, 1e-5),   # odd B (divisor pick), squeeze
        (2,  6, 32, 16, 4, jnp.float32, 1e-5),   # T padded + masked softmax
        (4, 10, 32, 16, 2, jnp.bfloat16, 1e-1),  # bf16: 16-sublane T padding
    ]

    for (B, T, d_in, d_hidden, n_head, dt, tol) in configs:
        key, kx, k1, k2 = jax.random.split(key, 4)
        x = jax.random.normal(kx, (B, T, d_in), dtype=jnp.float32).astype(dt)
        w1 = _xavier_uniform(k1, d_hidden, d_in).astype(dt)   # nn.Linear(d_in, d_hidden).weight
        w2 = _xavier_uniform(k2, n_head, d_hidden).astype(dt) # nn.Linear(d_hidden, n_head).weight

        out, attn = multi_head_self_attention(x, w1, w2)
        out = jax.block_until_ready(out)
        attn = jax.block_until_ready(attn)

        ref_out, ref_attn = _reference(x.astype(jnp.float32),
                                       w1.astype(jnp.float32),
                                       w2.astype(jnp.float32))
        assert out.shape == ref_out.shape, (out.shape, ref_out.shape)
        assert attn.shape == (B, T, n_head), attn.shape
        assert jnp.allclose(out.astype(jnp.float32), ref_out,
                            atol=tol, rtol=tol), (B, T, n_head, dt)
        assert jnp.allclose(attn.astype(jnp.float32), ref_attn,
                            atol=tol, rtol=tol), (B, T, n_head, dt)

    print("KERNEL_OK")
</pallas_src>

<mosaic_0001>
module attributes {stable_mosaic.version = 11 : i64} {
  func.func @_mhsa_kernel(%arg0: i32, %arg1: memref<16x8x32xf32, #tpu.memory_space<vmem>>, %arg2: memref<32x16xf32, #tpu.memory_space<vmem>>, %arg3: memref<16x4xf32, #tpu.memory_space<vmem>>, %arg4: memref<16x4x32xf32, #tpu.memory_space<vmem>>, %arg5: memref<16x8x4xf32, #tpu.memory_space<vmem>>) attributes {dimension_semantics = [#tpu.dimension_semantics<parallel>], iteration_bounds = array<i64: 1>, scalar_prefetch = 0 : i64, scratch_operands = 0 : i64, tpu.core_type = #tpu.core_type<tc>, window_params = [{transform_indices = @transform_0, window_bounds = array<i64: 16, 8, 32>}, {pipeline_mode = #tpu.pipeline_mode<synchronous>, transform_indices = @transform_1, window_bounds = array<i64: 32, 16>}, {pipeline_mode = #tpu.pipeline_mode<synchronous>, transform_indices = @transform_2, window_bounds = array<i64: 16, 4>}, {transform_indices = @transform_3, window_bounds = array<i64: 16, 4, 32>}, {transform_indices = @transform_4, window_bounds = array<i64: 16, 8, 4>}]} {
    %c0 = arith.constant 0 : index
    %c0_0 = arith.constant 0 : index
    %c0_1 = arith.constant 0 : index
    %0 = vector.load %arg1[%c0, %c0_0, %c0_1] : memref<16x8x32xf32, #tpu.memory_space<vmem>>, vector<16x8x32xf32>
    %1 = vector.shape_cast %0 : vector<16x8x32xf32> to vector<128x32xf32>
    %c0_2 = arith.constant 0 : index
    %c0_3 = arith.constant 0 : index
    %2 = vector.load %arg2[%c0_2, %c0_3] : memref<32x16xf32, #tpu.memory_space<vmem>>, vector<32x16xf32>
    %cst = arith.constant dense<0.000000e+00> : vector<128x16xf32>
    %3 = tpu.matmul %1, %2, %cst {dimension_numbers = #tpu.dot_dimension_numbers<[1], [0], [0], [1], [0, 0, 1, 1], [], []>} : vector<128x32xf32>, vector<32x16xf32>, vector<128x16xf32> -> vector<128x16xf32>
    %4 = math.tanh %3 : vector<128x16xf32>
    %c0_4 = arith.constant 0 : index
    %c0_5 = arith.constant 0 : index
    %5 = vector.load %arg3[%c0_4, %c0_5] : memref<16x4xf32, #tpu.memory_space<vmem>>, vector<16x4xf32>
    %cst_6 = arith.constant dense<0.000000e+00> : vector<128x4xf32>
    %6 = tpu.matmul %4, %5, %cst_6 {dimension_numbers = #tpu.dot_dimension_numbers<[1], [0], [0], [1], [0, 0, 1, 1], [], []>} : vector<128x16xf32>, vector<16x4xf32>, vector<128x4xf32> -> vector<128x4xf32>
    %7 = vector.shape_cast %6 : vector<128x4xf32> to vector<16x8x4xf32>
    %cst_7 = arith.constant dense<0xFF800000> : vector<16x4xf32>
    %8 = vector.multi_reduction <maximumf>, %7, %cst_7 [1] : vector<16x8x4xf32> to vector<16x4xf32>
    %9 = vector.shape_cast %8 : vector<16x4xf32> to vector<16x1x4xf32>
    %10 = vector.broadcast %9 : vector<16x1x4xf32> to vector<16x8x4xf32>
    %11 = arith.subf %7, %10 : vector<16x8x4xf32>
    %12 = math.exp %11 : vector<16x8x4xf32>
    %cst_8 = arith.constant dense<0.000000e+00> : vector<16x4xf32>
    %13 = vector.multi_reduction <add>, %12, %cst_8 [1] : vector<16x8x4xf32> to vector<16x4xf32>
    %14 = vector.shape_cast %13 : vector<16x4xf32> to vector<16x1x4xf32>
    %15 = tpu.reciprocal %14 : vector<16x1x4xf32> -> vector<16x1x4xf32>
    %16 = vector.broadcast %15 : vector<16x1x4xf32> to vector<16x8x4xf32>
    %17 = arith.mulf %12, %16 : vector<16x8x4xf32>
    %c0_9 = arith.constant 0 : index
    %c0_10 = arith.constant 0 : index
    %c0_11 = arith.constant 0 : index
    %18 = vector.load %arg5[%c0_9, %c0_10, %c0_11] : memref<16x8x4xf32, #tpu.memory_space<vmem>>, vector<16x8x4xf32>
    tpu.vector_store %arg5[%c0_9, %c0_10, %c0_11], %17 {strides = array<i32>} : memref<16x8x4xf32, #tpu.memory_space<vmem>>, vector<16x8x4xf32>,
    %c0_12 = arith.constant 0 : index
    %c0_13 = arith.constant 0 : index
    %c0_14 = arith.constant 0 : index
    %19 = vector.load %arg1[%c0_12, %c0_13, %c0_14] : memref<16x8x32xf32, #tpu.memory_space<vmem>>, vector<16x8x32xf32>
    %cst_15 = arith.constant dense<0.000000e+00> : vector<16x4x32xf32>
    %20 = tpu.matmul %17, %19, %cst_15 {dimension_numbers = #tpu.dot_dimension_numbers<[1], [1], [2], [2], [0, 0, 0, 2, 1, 2], [0], [0]>} : vector<16x8x4xf32>, vector<16x8x32xf32>, vector<16x4x32xf32> -> vector<16x4x32xf32>
    %c0_16 = arith.constant 0 : index
    %c0_17 = arith.constant 0 : index
    %c0_18 = arith.constant 0 : index
    %21 = vector.load %arg4[%c0_16, %c0_17, %c0_18] : memref<16x4x32xf32, #tpu.memory_space<vmem>>, vector<16x4x32xf32>
    tpu.vector_store %arg4[%c0_16, %c0_17, %c0_18], %20 {strides = array<i32>} : memref<16x4x32xf32, #tpu.memory_space<vmem>>, vector<16x4x32xf32>,
    return
  }
  func.func @transform_0(%arg0: i32) -> (i32, i32, i32) {
    %c0_i32 = arith.constant 0 : i32
    %c0_i32_0 = arith.constant 0 : i32
    %c0_i32_1 = arith.constant 0 : i32
    return %arg0, %c0_i32, %c0_i32_0 : i32, i32, i32
  }
  func.func @transform_1(%arg0: i32) -> (i32, i32) {
    %c0_i32 = arith.constant 0 : i32
    %c0_i32_0 = arith.constant 0 : i32
    %c0_i32_1 = arith.constant 0 : i32
    return %c0_i32, %c0_i32_0 : i32, i32
  }
  func.func @transform_2(%arg0: i32) -> (i32, i32) {
    %c0_i32 = arith.constant 0 : i32
    %c0_i32_0 = arith.constant 0 : i32
    %c0_i32_1 = arith.constant 0 : i32
    return %c0_i32, %c0_i32_0 : i32, i32
  }
  func.func @transform_3(%arg0: i32) -> (i32, i32, i32) {
    %c0_i32 = arith.constant 0 : i32
    %c0_i32_0 = arith.constant 0 : i32
    %c0_i32_1 = arith.constant 0 : i32
    return %arg0, %c0_i32, %c0_i32_0 : i32, i32, i32
  }
  func.func @transform_4(%arg0: i32) -> (i32, i32, i32) {
    %c0_i32 = arith.constant 0 : i32
    %c0_i32_0 = arith.constant 0 : i32
    %c0_i32_1 = arith.constant 0 : i32
    return %arg0, %c0_i32, %c0_i32_0 : i32, i32, i32
  }
}

module attributes {stable_mosaic.version = 11 : i64} {
  func.func @_mhsa_kernel(%arg0: i32, %arg1: memref<16x8x32xf32, #tpu.memory_space<vmem>>, %arg2: memref<32x16xf32, #tpu.memory_space<vmem>>, %arg3: memref<16x4xf32, #tpu.memory_space<vmem>>, %arg4: memref<16x4x32xf32, #tpu.memory_space<vmem>>, %arg5: memref<16x8x4xf32, #tpu.memory_space<vmem>>) attributes {dimension_semantics = [#tpu.dimension_semantics<parallel>], iteration_bounds = array<i64: 1>, scalar_prefetch = 0 : i64, scratch_operands = 0 : i64, tpu.core_type = #tpu.core_type<tc>, window_params = [{transform_indices = @transform_0, window_bounds = array<i64: 16, 8, 32>}, {pipeline_mode = #tpu.pipeline_mode<synchronous>, transform_indices = @transform_1, window_bounds = array<i64: 32, 16>}, {pipeline_mode = #tpu.pipeline_mode<synchronous>, transform_indices = @transform_2, window_bounds = array<i64: 16, 4>}, {transform_indices = @transform_3, window_bounds = array<i64: 16, 4, 32>}, {transform_indices = @transform_4, window_bounds = array<i64: 16, 8, 4>}]} {
    %c0 = arith.constant 0 : index
    %c0_0 = arith.constant 0 : index
    %c0_1 = arith.constant 0 : index
    %0 = vector.load %arg1[%c0, %c0_0, %c0_1] : memref<16x8x32xf32, #tpu.memory_space<vmem>>, vector<16x8x32xf32>
    %1 = vector.shape_cast %0 : vector<16x8x32xf32> to vector<128x32xf32>
    %c0_2 = arith.constant 0 : index
    %c0_3 = arith.constant 0 : index
    %2 = vector.load %arg2[%c0_2, %c0_3] : memref<32x16xf32, #tpu.memory_space<vmem>>, vector<32x16xf32>
    %cst = arith.constant dense<0.000000e+00> : vector<128x16xf32>
    %3 = tpu.matmul %1, %2, %cst {dimension_numbers = #tpu.dot_dimension_numbers<[1], [0], [0], [1], [0, 0, 1, 1], [], []>} : vector<128x32xf32>, vector<32x16xf32>, vector<128x16xf32> -> vector<128x16xf32>
    %4 = math.tanh %3 : vector<128x16xf32>
    %c0_4 = arith.constant 0 : index
    %c0_5 = arith.constant 0 : index
    %5 = vector.load %arg3[%c0_4, %c0_5] : memref<16x4xf32, #tpu.memory_space<vmem>>, vector<16x4xf32>
    %cst_6 = arith.constant dense<0.000000e+00> : vector<128x4xf32>
    %6 = tpu.matmul %4, %5, %cst_6 {dimension_numbers = #tpu.dot_dimension_numbers<[1], [0], [0], [1], [0, 0, 1, 1], [], []>} : vector<128x16xf32>, vector<16x4xf32>, vector<128x4xf32> -> vector<128x4xf32>
    %7 = vector.shape_cast %6 : vector<128x4xf32> to vector<16x8x4xf32>
    %cst_7 = arith.constant dense<0xFF800000> : vector<16x4xf32>
    %8 = vector.multi_reduction <maximumf>, %7, %cst_7 [1] : vector<16x8x4xf32> to vector<16x4xf32>
    %9 = vector.shape_cast %8 : vector<16x4xf32> to vector<16x1x4xf32>
    %10 = vector.broadcast %9 : vector<16x1x4xf32> to vector<16x8x4xf32>
    %11 = arith.subf %7, %10 : vector<16x8x4xf32>
    %12 = math.exp %11 : vector<16x8x4xf32>
    %cst_8 = arith.constant dense<0.000000e+00> : vector<16x4xf32>
    %13 = vector.multi_reduction <add>, %12, %cst_8 [1] : vector<16x8x4xf32> to vector<16x4xf32>
    %14 = vector.shape_cast %13 : vector<16x4xf32> to vector<16x1x4xf32>
    %15 = tpu.reciprocal %14 : vector<16x1x4xf32> -> vector<16x1x4xf32>
    %16 = vector.broadcast %15 : vector<16x1x4xf32> to vector<16x8x4xf32>
    %17 = arith.mulf %12, %16 : vector<16x8x4xf32>
    %c0_9 = arith.constant 0 : index
    %c0_10 = arith.constant 0 : index
    %c0_11 = arith.constant 0 : index
    %18 = vector.load %arg5[%c0_9, %c0_10, %c0_11] : memref<16x8x4xf32, #tpu.memory_space<vmem>>, vector<16x8x4xf32>
    tpu.vector_store %arg5[%c0_9, %c0_10, %c0_11], %17 {strides = array<i32>} : memref<16x8x4xf32, #tpu.memory_space<vmem>>, vector<16x8x4xf32>,
    %c0_12 = arith.constant 0 : index
    %c0_13 = arith.constant 0 : index
    %c0_14 = arith.constant 0 : index
    %19 = vector.load %arg1[%c0_12, %c0_13, %c0_14] : memref<16x8x32xf32, #tpu.memory_space<vmem>>, vector<16x8x32xf32>
    %cst_15 = arith.constant dense<0.000000e+00> : vector<16x4x32xf32>
    %20 = tpu.matmul %17, %19, %cst_15 {dimension_numbers = #tpu.dot_dimension_numbers<[1], [1], [2], [2], [0, 0, 0, 2, 1, 2], [0], [0]>} : vector<16x8x4xf32>, vector<16x8x32xf32>, vector<16x4x32xf32> -> vector<16x4x32xf32>
    %c0_16 = arith.constant 0 : index
    %c0_17 = arith.constant 0 : index
    %c0_18 = arith.constant 0 : index
    %21 = vector.load %arg4[%c0_16, %c0_17, %c0_18] : memref<16x4x32xf32, #tpu.memory_space<vmem>>, vector<16x4x32xf32>
    tpu.vector_store %arg4[%c0_16, %c0_17, %c0_18], %20 {strides = array<i32>} : memref<16x4x32xf32, #tpu.memory_space<vmem>>, vector<16x4x32xf32>,
    return
  }
  func.func @transform_0(%arg0: i32) -> (i32, i32, i32) {
    %c0_i32 = arith.constant 0 : i32
    %c0_i32_0 = arith.constant 0 : i32
    %c0_i32_1 = arith.constant 0 : i32
    return %arg0, %c0_i32, %c0_i32_0 : i32, i32, i32
  }
  func.func @transform_1(%arg0: i32) -> (i32, i32) {
    %c0_i32 = arith.constant 0 : i32
    %c0_i32_0 = arith.constant 0 : i32
    %c0_i32_1 = arith.constant 0 : i32
    return %c0_i32, %c0_i32_0 : i32, i32
  }
  func.func @transform_2(%arg0: i32) -> (i32, i32) {
    %c0_i32 = arith.constant 0 : i32
    %c0_i32_0 = arith.constant 0 : i32
    %c0_i32_1 = arith.constant 0 : i32
    return %c0_i32, %c0_i32_0 : i32, i32
  }
  func.func @transform_3(%arg0: i32) -> (i32, i32, i32) {
    %c0_i32 = arith.constant 0 : i32
    %c0_i32_0 = arith.constant 0 : i32
    %c0_i32_1 = arith.constant 0 : i32
    return %arg0, %c0_i32, %c0_i32_0 : i32, i32, i32
  }
  func.func @transform_4(%arg0: i32) -> (i32, i32, i32) {
    %c0_i32 = arith.constant 0 : i32
    %c0_i32_0 = arith.constant 0 : i32
    %c0_i32_1 = arith.constant 0 : i32
    return %arg0, %c0_i32, %c0_i32_0 : i32, i32, i32
  }
}

</mosaic_0001>

<bundles_post_ra>
// kernel: tpu_custom_call.1
= control target key start
LH: loop header
LB: loop body
LE: loop exit
PB: predicated region body
PF: predicated region fallthrough
CT: control target
= control target key end

     0   :  { %10 = vsyncpa [#allocation3], 0  ;;  %s3519_s0 = inlined_call_operand.hbm [shape: f32[16,8,32], index: 0, kind: input, shape index: {}]   ;;  %s3520_s1 = inlined_call_operand.hbm [shape: f32[32,16], index: 1, kind: input, shape index: {}]   ;;  %s3521_s2 = inlined_call_operand.hbm [shape: f32[16,4], index: 2, kind: input, shape index: {}]   ;;  %s3522_s3 = inlined_call_operand.hbm [shape: f32[16,4,32], index: 3, kind: output, shape index: {0}]   ;;  %s3523_s4 = inlined_call_operand.hbm [shape: f32[16,8,4], index: 4, kind: output, shape index: {1}]  }
   0x1   :  { %11 = vsyncpa [#allocation6], 0 }
   0x2   :  { %12 = vsyncpa [#allocation4], 0 }
   0x3   :  { %13 = vsyncpa [#allocation10], 0  ;;  %s3058_s15 = smov [#allocation5]   ;;  %s3059_s17 = smov [#allocation2]  }
   0x4   :  { %s31_s16 = sshll.u32 %s3058_s15, 4  ;;  %s19_s18 = sshll.u32 %s3059_s17, 4  ;;  %s32_s16 = int_to_ptr.vmem [resolvable:$true] %s31_s16  ;;  %s3094_s18 = int_to_ptr.vmem [resolvable:$true] %s19_s18 }
   0x5   :  { %s2940_s21 = scalar_lea.hbm %s3520_s1, 512 }
   0x6   :  { %p2941_p0 = scmp.ne.s32.totalorder %s3520_s1, %s2940_s21  ;;  %p2944_p1 = scmp.lt.u32.totalorder %s2940_s21, %s3520_s1 }
   0x8   :  { %p2946_p2 = pnand %p2944_p1, %p2941_p0 }
   0xa   :  { %2949 = shalt.err (!%p2946_p2)
}
   0xb   :  { %s2950_s26 = scalar_lea.vmem %s32_s16, 512  ;;  %p2955_p4 = scmp.lt.s32.totalorder %s32_s16, %s32_s16 }
   0xc   :  { %p2951_p3 = scmp.ne.s32.totalorder %s32_s16, %s2950_s26  ;;  %p2956_p5 = scmp.lt.s32.totalorder %s2950_s26, %s2950_s26 }
   0xe   :  { %p2957_p6 = por %p2956_p5, %p2955_p4 }
  0x10   :  { %p2958_p7 = pnand %p2957_p6, %p2951_p3 }
  0x12   :  { %2961 = shalt.err (!%p2958_p7)
}
  0x13   :  { %s3060_s27 = smov 128   ;;  %s3061_s28 = smov 8  }
  0x14   :  { %37 = dma.hbm_to_vmem [thread:$0]  %s3520_s1, 512, %s32_s16, [#allocation6], %s3060_s27, %s3060_s27, %s3061_s28  }
  0x15   :  { %s2962_s7 = scalar_lea.hbm %s3519_s0, 2048 }
  0x16   :  { %p2963_p8 = scmp.ne.s32.totalorder %s3519_s0, %s2962_s7  ;;  %p2966_p9 = scmp.lt.u32.totalorder %s2962_s7, %s3519_s0 }
  0x18   :  { %p2968_p10 = pnand %p2966_p9, %p2963_p8 }
  0x1a   :  { %2971 = shalt.err (!%p2968_p10)
}
  0x1b   :  { %s2972_s12 = scalar_lea.vmem %s3094_s18, 2048  ;;  %p2977_p12 = scmp.lt.s32.totalorder %s3094_s18, %s3094_s18 }
  0x1c   :  { %p2973_p11 = scmp.ne.s32.totalorder %s3094_s18, %s2972_s12  ;;  %p2978_p13 = scmp.lt.s32.totalorder %s2972_s12, %s2972_s12 }
  0x1e   :  { %p2979_p0 = por %p2978_p13, %p2977_p12 }
  0x20   :  { %p2980_p1 = pnand %p2979_p0, %p2973_p11 }
  0x22   :  { %2983 = shalt.err (!%p2980_p1)
}
  0x23   :  { %25 = dma.hbm_to_vmem [thread:$0]  %s3519_s0, 2048, %s3094_s18, [#allocation3], %s3060_s27, %s3060_s27, %s3061_s28  }
  0x24   :  { %s3062_s14 = smov [#allocation7]   ;;  %s2984_s19 = scalar_lea.hbm %s3521_s2, 256 }
  0x25   :  { %s43_s15 = sshll.u32 %s3062_s14, 4  ;;  %p2985_p2 = scmp.ne.s32.totalorder %s3521_s2, %s2984_s19  ;;  %s44_s15 = int_to_ptr.vmem [resolvable:$true] %s43_s15 }
  0x26   :  { %p2988_p3 = scmp.lt.u32.totalorder %s2984_s19, %s3521_s2 }
  0x28   :  { %p2990_p4 = pnand %p2988_p3, %p2985_p2 }
  0x2a   :  { %2993 = shalt.err (!%p2990_p4)
}
  0x2b   :  { %s2994_s24 = scalar_lea.vmem %s44_s15, 256  ;;  %p2999_p6 = scmp.lt.s32.totalorder %s44_s15, %s44_s15 }
  0x2c   :  { %p2995_p5 = scmp.ne.s32.totalorder %s44_s15, %s2994_s24  ;;  %p3000_p7 = scmp.lt.s32.totalorder %s2994_s24, %s2994_s24 }
  0x2e   :  { %p3001_p8 = por %p3000_p7, %p2999_p6 }
  0x30   :  { %p3002_p9 = pnand %p3001_p8, %p2995_p5 }
  0x32   :  { %3005 = shalt.err (!%p3002_p9)
}
  0x33   :  { %49 = dma.hbm_to_vmem [thread:$0]  %s3521_s2, 256, %s44_s15, [#allocation6], %s3060_s27, %s3060_s27, %s3061_s28  }
  0x34   :  { %3050 = dma.done.wait [#allocation3], 2048  }
  0x35   :  { %3051 = vsyncadd [#allocation3], 4294965248 }
  0x36   :  { %3052 = dma.done.wait [#allocation6], 768  }
  0x37   :  { %3053 = vsyncadd [#allocation6], 4294966528  ;;  %vm79_vm0 = vcmask 261120   ;;  %v75_v0 = vld [vmem:[#allocation5] sm:$0xff]  ;;  %v76_v1 = vld [vmem:[#allocation5 + $0x8] sm:$0xff]  ;;  %vm291_vm1 = vcmask 130048  }
  0x38   :  { %v77_v2 = vld [vmem:[#allocation5 + $0x10] sm:$0xff]  ;;  %v2812_v3 = vpack.c.bf16 %v76_v1, %v75_v0  ;;  %v78_v4 = vld [vmem:[#allocation5 + $0x18] sm:$0xff]  ;;  %v3146_v5 = vld [vmem:[#allocation2] sm:$0xff]  ;;  %v3063_v57 = vmov 0.0   ;;  %vm485_vm2 = vcmask 31744   ;;  %vm3064_vm3 = vmmov 0  }
  0x39   :  { %v2816_v6 = vpack.c.bf16 %v78_v4, %v77_v2  ;;  %2680 = vmatprep.mubr.msk.f32.mxu0 %vm79_vm0, %v3146_v5  ;;  %v3150_v7 = vld [vmem:[#allocation2 + $0x8] sm:$0xff]  ;;  %v3152_v8 = vld [vmem:[#allocation2 + $0x10] sm:$0xff]  ;;  %v3158_v9 = vld [vmem:[#allocation2 + $0x18] sm:$0xff]  ;;  %vm854_vm4 = vcmask 64512   ;;  %s3065_s2 = smov [#allocation9]  }
  0x3a   :  { %2813 = vmatprep.subr.bf16.mxu0 %v2812_v3  ;;  %v3160_v10 = vld [vmem:[#allocation2 + $0x20] sm:$0xff]  ;;  %v3166_v11 = vld [vmem:[#allocation2 + $0x28] sm:$0xff]  ;;  %v3168_v12 = vld [vmem:[#allocation2 + $0x30] sm:$0xff]  ;;  %s2537_s25 = sshll.u32 %s3065_s2, 4  ;;  %s2538_s25 = int_to_ptr.vmem [resolvable:$true] %s2537_s25 }
  0x3b   :  { %2815 = vmatpush3.bf16.msra.mxu0 %v2812_v3  ;;  %v66_v13 = vld [vmem:[#allocation2 + $0x38] sm:$0xff]  ;;  %v67_v14 = vld [vmem:[#allocation2 + $0x40] sm:$0xff]  ;;  %v68_v15 = vld [vmem:[#allocation2 + $0x48] sm:$0xff]  ;;  %s3006_s26 = scalar_lea.vmem %s2538_s25, 2048  ;;  %p3011_p11 = scmp.lt.s32.totalorder %s2538_s25, %s2538_s25 }
  0x3c   :  { %2817 = vmatprep.subr.bf16.mxu0 %v2816_v6  ;;  %v69_v16 = vld [vmem:[#allocation2 + $0x50] sm:$0xff]  ;;  %v70_v17 = vld [vmem:[#allocation2 + $0x58] sm:$0xff]  ;;  %v71_v18 = vld [vmem:[#allocation2 + $0x60] sm:$0xff]  ;;  %p3007_p10 = scmp.ne.s32.totalorder %s2538_s25, %s3006_s26  ;;  %p3012_p12 = scmp.lt.s32.totalorder %s3006_s26, %s3006_s26 }
  0x3d   :  { %v72_v19 = vld [vmem:[#allocation2 + $0x68] sm:$0xff]  ;;  %v73_v20 = vld [vmem:[#allocation2 + $0x70] sm:$0xff]  ;;  %v74_v21 = vld [vmem:[#allocation2 + $0x78] sm:$0xff] }
  0x3e   :  { %v289_v22 = vld [vmem:[#allocation7] sm:$0xff]  ;;  %v290_v23 = vld [vmem:[#allocation7 + $0x8] sm:$0xff]  ;;  %p3013_p13 = por %p3012_p12, %p3011_p11 }
  0x3f   :  { %2819 = vmatpush3.bf16.msra.mxu0 %v2816_v6  ;;  %v2820_v24 = vpack.c.bf16 %v290_v23, %v289_v22 }
  0x40   :  { %2737 = vmatprep.subr.mxu0 %v3063_v57  ;;  %p3014_p0 = pnand %p3013_p13, %p3007_p10 }
  0x41   :  { %2821 = vmatprep.subr.bf16.mxu1 %v2820_v24 }
  0x42   :  { %2681 = vmatmul.mubr.msk.f32.vlgmr.msra.gmra.mrb[0].mxu0 %vm79_vm0, %v3150_v7  ;;  %2823 = vmatpush3.bf16.msra.mxu1 %v2820_v24 }
  0x43   :  { %2683 = vmatprep.mubr.msk.f32.mxu0 %vm79_vm0, %v3152_v8  ;;  %2732 = vmatprep.subr.mxu1 %v3063_v57 }
  0x44   :  { %2738 = vmatpush3.msra.mxu0 %v3150_v7 }
  0x45   :  { %2747 = vmatprep.subr.mxu0 %v3063_v57 }
  0x46   :  { %2684 = vmatmul.mubr.msk.f32.gmra.mrb[2].mxu0 %vm79_vm0, %v3158_v9 }
  0x47   :  { %2686 = vmatprep.mubr.msk.f32.mxu0 %vm79_vm0, %v3160_v10 }
  0x4a   :  { %2687 = vmatmul.mubr.msk.f32.gmra.mrb[4].mxu0 %vm79_vm0, %v3166_v11 }
  0x4b   :  { %2689 = vmatprep.mubr.msk.f32.mxu0 %vm79_vm0, %v3168_v12 }
  0x4e   :  { %2690 = vmatmul.mubr.msk.f32.gmra.mrb[6].mxu0 %vm79_vm0, %v66_v13 }
  0x4f   :  { %2692 = vmatprep.mubr.msk.f32.mxu0 %vm79_vm0, %v67_v14 }
  0x52   :  { %2693 = vmatmul.mubr.msk.f32.gmra.mrb[8].mxu0 %vm79_vm0, %v68_v15 }
  0x53   :  { %2695 = vmatprep.mubr.msk.f32.mxu0 %vm79_vm0, %v69_v16 }
  0x56   :  { %2696 = vmatmul.mubr.msk.f32.gmra.mrb[10].mxu0 %vm79_vm0, %v70_v17 }
  0x57   :  { %2698 = vmatprep.mubr.msk.f32.mxu0 %vm79_vm0, %v71_v18 }
  0x5a   :  { %2699 = vmatmul.mubr.msk.f32.gmra.mrb[12].mxu0 %vm79_vm0, %v72_v19 }
  0x5b   :  { %2701 = vmatprep.mubr.msk.f32.mxu0 %vm79_vm0, %v73_v20 }
  0x5e   :  { %2702 = vmatmul.mubr.msk.f32.gmra.mrb[14].mxu0 %vm79_vm0, %v74_v21 }
  0x5f   :  { %2739 = vmatprep.mubr.msk.f32.mxu0 %vm3064_vm3, %v3063_v57 }
 0x115   :  { %v2682_v25 = vpop.f32.mrb[0].mxu0 }
 0x116   :  { %v194_v26 = vpop.f32.mrb[1].mxu0 }
 0x117   :  { %2835 = vtanh.f32 %v194_v26 }
 0x118   :  { %2837 = vtanh.f32 %v2682_v25 }
 0x119   :  { %v2685_v27 = vpop.f32.mrb[2].mxu0 }
 0x11a   :  { %2839 = vtanh.f32 %v2685_v27  ;;  %v204_v28 = vpop.f32.mrb[3].mxu0 }
 0x11b   :  { %2841 = vtanh.f32 %v204_v28 }
 0x11d   :  { %v2688_v29 = vpop.f32.mrb[4].mxu0 }
 0x11e   :  { %2843 = vtanh.f32 %v2688_v29  ;;  %v214_v30 = vpop.f32.mrb[5].mxu0 }
 0x11f   :  { %2845 = vtanh.f32 %v214_v30 }
 0x121   :  { %v2836_v31 = vpop.eup %2835  ;;  %v2691_v32 = vpop.f32.mrb[6].mxu0 }
 0x122   :  { %v2838_v33 = vpop.eup %2837  ;;  %2847 = vtanh.f32 %v2691_v32  ;;  %v224_v34 = vpop.f32.mrb[7].mxu0  ;;  %2708 = vmatprep.mubr.msk.f32.mxu1 %vm291_vm1, %v2836_v31 }
 0x123   :  { %2849 = vtanh.f32 %v224_v34  ;;  %2709 = vmatmul.mubr.msk.f32.vlgmr.msra.gmra.mrb[0].mxu1 %vm291_vm1, %v2838_v33 }
 0x124   :  { %v2840_v35 = vpop.eup %2839  ;;  %2733 = vmatpush3.msra.mxu1 %v3146_v5 }
 0x125   :  { %v2842_v36 = vpop.eup %2841  ;;  %v2694_v37 = vpop.f32.mrb[8].mxu0  ;;  %2742 = vmatprep.subr.mxu1 %v3063_v57 }
 0x126   :  { %2851 = vtanh.f32 %v2694_v37  ;;  %v234_v38 = vpop.f32.mrb[9].mxu0  ;;  %2711 = vmatprep.mubr.msk.f32.mxu1 %vm291_vm1, %v2842_v36 }
 0x127   :  { %2853 = vtanh.f32 %v234_v38  ;;  %2712 = vmatmul.mubr.msk.f32.gmra.mrb[2].mxu1 %vm291_vm1, %v2840_v35 }
 0x128   :  { %v2844_v39 = vpop.eup %2843 }
 0x129   :  { %v2846_v40 = vpop.eup %2845  ;;  %v2697_v41 = vpop.f32.mrb[10].mxu0 }
 0x12a   :  { %2855 = vtanh.f32 %v2697_v41  ;;  %v244_v42 = vpop.f32.mrb[11].mxu0  ;;  %2714 = vmatprep.mubr.msk.f32.mxu1 %vm291_vm1, %v2846_v40 }
 0x12b   :  { %2857 = vtanh.f32 %v244_v42  ;;  %2715 = vmatmul.mubr.msk.f32.gmra.mrb[4].mxu1 %vm291_vm1, %v2844_v39 }
 0x12c   :  { %v2848_v43 = vpop.eup %2847 }
 0x12d   :  { %v2850_v44 = vpop.eup %2849  ;;  %v2700_v45 = vpop.f32.mrb[12].mxu0 }
 0x12e   :  { %2859 = vtanh.f32 %v2700_v45  ;;  %v254_v46 = vpop.f32.mrb[13].mxu0  ;;  %2717 = vmatprep.mubr.msk.f32.mxu1 %vm291_vm1, %v2850_v44 }
 0x12f   :  { %2861 = vtanh.f32 %v254_v46  ;;  %2718 = vmatmul.mubr.msk.f32.gmra.mrb[6].mxu1 %vm291_vm1, %v2848_v43 }
 0x130   :  { %v2852_v47 = vpop.eup %2851 }
 0x131   :  { %v2854_v48 = vpop.eup %2853  ;;  %v2703_v49 = vpop.f32.mrb[14].mxu0 }
 0x132   :  { %2863 = vtanh.f32 %v2703_v49  ;;  %v264_v50 = vpop.f32.mrb[15].mxu0  ;;  %2720 = vmatprep.mubr.msk.f32.mxu1 %vm291_vm1, %v2854_v48 }
 0x133   :  { %2865 = vtanh.f32 %v264_v50  ;;  %2721 = vmatmul.mubr.msk.f32.gmra.mrb[8].mxu1 %vm291_vm1, %v2852_v47 }
 0x134   :  { %v2856_v51 = vpop.eup %2855 }
 0x135   :  { %v2858_v52 = vpop.eup %2857 }
 0x136   :  { %2723 = vmatprep.mubr.msk.f32.mxu1 %vm291_vm1, %v2858_v52 }
 0x137   :  { %2724 = vmatmul.mubr.msk.f32.gmra.mrb[10].mxu1 %vm291_vm1, %v2856_v51 }
 0x138   :  { %v2860_v53 = vpop.eup %2859 }
 0x139   :  { %v2862_v54 = vpop.eup %2861 }
 0x13a   :  { %2726 = vmatprep.mubr.msk.f32.mxu1 %vm291_vm1, %v2862_v54 }
 0x13b   :  { %2727 = vmatmul.mubr.msk.f32.gmra.mrb[12].mxu1 %vm291_vm1, %v2860_v53 }
 0x13c   :  { %v2864_v55 = vpop.eup %2863 }
 0x13d   :  { %v2866_v56 = vpop.eup %2865 }
 0x13e   :  { %2729 = vmatprep.mubr.msk.f32.mxu1 %vm291_vm1, %v2866_v56 }
 0x13f   :  { %2730 = vmatmul.mubr.msk.f32.gmra.mrb[14].mxu1 %vm291_vm1, %v2864_v55 }
 0x140   :  { %2734 = vmatprep.mubr.msk.f32.mxu1 %vm3064_vm3, %v3063_v57 }
 0x1f6   :  { %v2710_v58 = vpop.f32.mrb[0].mxu1 }
 0x1f7   :  { %v493_v59 = vsel %vm485_vm2, %v2710_v58, -inf  ;;  %v406_v60 = vpop.f32.mrb[1].mxu1 }
 0x1f8   :  { %v494_v61 = vrot.slane %v493_v59, 4  ;;  %v486_v62 = vsel %vm485_vm2, %v406_v60, -inf }
 0x1f9   :  { %v487_v63 = vrot.slane %v486_v62, 4 }
 0x1fa   :  { %v495_v0 = vmax.f32 %v493_v59, %v494_v61  ;;  %v2713_v1 = vpop.f32.mrb[2].mxu1 }
 0x1fb   :  { %v488_v2 = vmax.f32 %v486_v62, %v487_v63  ;;  %v507_v3 = vsel %vm485_vm2, %v2713_v1, -inf  ;;  %v416_v4 = vpop.f32.mrb[3].mxu1 }
 0x1fc   :  { %v496_v5 = vrot.slane %v495_v0, 2  ;;  %v508_v6 = vrot.slane %v507_v3, 4  ;;  %v500_v7 = vsel %vm485_vm2, %v416_v4, -inf }
 0x1fd   :  { %v489_v13 = vrot.slane %v488_v2, 2  ;;  %v501_v14 = vrot.slane %v500_v7, 4 }
 0x1fe   :  { %v497_v15 = vmax.f32 %v495_v0, %v496_v5  ;;  %v509_v16 = vmax.f32 %v507_v3, %v508_v6  ;;  %v3209_v17 = vpop.f32.mrb[4].mxu1 }
 0x1ff   :  { %v490_v18 = vmax.f32 %v488_v2, %v489_v13  ;;  %v502_v19 = vmax.f32 %v500_v7, %v501_v14  ;;  %v521_v20 = vsel %vm485_vm2, %v3209_v17, -inf  ;;  %v3213_v21 = vpop.f32.mrb[5].mxu1 }
 0x200   :  { %v498_v22 = vrot.slane %v497_v15, 1  ;;  %v510_v23 = vrot.slane %v509_v16, 2  ;;  %v522_v24 = vrot.slane %v521_v20, 4  ;;  %v514_v25 = vsel %vm485_vm2, %v3213_v21, -inf }
 0x201   :  { %v491_v26 = vrot.slane %v490_v18, 1  ;;  %v503_v27 = vrot.slane %v502_v19, 2  ;;  %v515_v28 = vrot.slane %v514_v25, 4 }
 0x202   :  { %v499_v29 = vmax.f32 %v497_v15, %v498_v22  ;;  %v511_v30 = vmax.f32 %v509_v16, %v510_v23  ;;  %v523_v31 = vmax.f32 %v521_v20, %v522_v24  ;;  %v3217_v32 = vpop.f32.mrb[6].mxu1 }
 0x203   :  { %v492_v33 = vmax.f32 %v490_v18, %v491_v26  ;;  %v504_v34 = vmax.f32 %v502_v19, %v503_v27  ;;  %v516_v35 = vmax.f32 %v514_v25, %v515_v28  ;;  %v535_v36 = vsel %vm485_vm2, %v3217_v32, -inf  ;;  %v3221_v37 = vpop.f32.mrb[7].mxu1 }
 0x204   :  { %v599_v38 = vsub.f32 %v2710_v58, %v499_v29  ;;  %v512_v39 = vrot.slane %v511_v30, 1  ;;  %v524_v40 = vrot.slane %v523_v31, 2  ;;  %v536_v41 = vrot.slane %v535_v36, 4 }
 0x205   :  { %v598_v42 = vsub.f32 %v406_v60, %v492_v33  ;;  %v505_v43 = vrot.slane %v504_v34, 1  ;;  %v517_v44 = vrot.slane %v516_v35, 2  ;;  %v528_v45 = vsel %vm485_vm2, %v3221_v37, -inf }
 0x206   :  { %v616_v46 = vmul.f32 1.442695, %v599_v38  ;;  %v513_v47 = vmax.f32 %v511_v30, %v512_v39  ;;  %v525_v48 = vmax.f32 %v523_v31, %v524_v40  ;;  %v537_v49 = vmax.f32 %v535_v36, %v536_v41  ;;  %v3225_v50 = vpop.f32.mrb[8].mxu1 }
 0x207   :  { %v614_v51 = vmul.f32 1.442695, %v598_v42  ;;  %v506_v52 = vmax.f32 %v504_v34, %v505_v43  ;;  %v518_v53 = vmax.f32 %v516_v35, %v517_v44  ;;  %v529_v54 = vrot.slane %v528_v45, 4  ;;  %v3227_v55 = vpop.f32.mrb[9].mxu1 }
 0x208   :  { %2867 = vpow2.f32 %v616_v46  ;;  %v601_v56 = vsub.f32 %v2713_v1, %v513_v47  ;;  %v526_v58 = vrot.slane %v525_v48, 1  ;;  %v538_v59 = vrot.slane %v537_v49, 2 }
 0x209   :  { %2869 = vpow2.f32 %v614_v51  ;;  %v600_v60 = vsub.f32 %v416_v4, %v506_v52  ;;  %v519_v61 = vrot.slane %v518_v53, 1  ;;  %v530_v62 = vmax.f32 %v528_v45, %v529_v54 }
 0x20a   :  { %v620_v63 = vmul.f32 1.442695, %v601_v56  ;;  %v527_v0 = vmax.f32 %v525_v48, %v526_v58  ;;  %v539_v2 = vmax.f32 %v537_v49, %v538_v59  ;;  %v549_v3 = vsel %vm485_vm2, %v3225_v50, -inf  ;;  %v3231_v5 = vpop.f32.mrb[10].mxu1 }
 0x20b   :  { %v618_v6 = vmul.f32 1.442695, %v600_v60  ;;  %v520_v7 = vmax.f32 %v518_v53, %v519_v61  ;;  %v531_v13 = vrot.slane %v530_v62, 2  ;;  %v550_v14 = vrot.slane %v549_v3, 4  ;;  %v3233_v15 = vpop.f32.mrb[11].mxu1 }
 0x20c   :  { %2871 = vpow2.f32 %v620_v63  ;;  %v603_v1 = vsub.f32 %v3209_v17, %v527_v0  ;;  %v540_v4 = vrot.slane %v539_v2, 1  ;;  %v542_v16 = vsel %vm485_vm2, %v3227_v55, -inf }
 0x20d   :  { %2873 = vpow2.f32 %v618_v6  ;;  %v602_v18 = vsub.f32 %v3213_v21, %v520_v7  ;;  %v532_v19 = vmax.f32 %v530_v62, %v531_v13  ;;  %v551_v20 = vmax.f32 %v549_v3, %v550_v14 }
 0x20e   :  { %v624_v22 = vmul.f32 1.442695, %v603_v1  ;;  %v541_v23 = vmax.f32 %v539_v2, %v540_v4  ;;  %v543_v24 = vrot.slane %v542_v16, 4  ;;  %v563_v25 = vsel %vm485_vm2, %v3231_v5, -inf  ;;  %v3241_v26 = vpop.f32.mrb[12].mxu1 }
 0x20f   :  { %v622_v27 = vmul.f32 1.442695, %v602_v18  ;;  %v533_v28 = vrot.slane %v532_v19, 1  ;;  %v552_v17 = vrot.slane %v551_v20, 2  ;;  %v564_v29 = vrot.slane %v563_v25, 4  ;;  %v3243_v30 = vpop.f32.mrb[13].mxu1 }
 0x210   :  { %2875 = vpow2.f32 %v624_v22  ;;  %v605_v31 = vsub.f32 %v3217_v32, %v541_v23  ;;  %v544_v21 = vmax.f32 %v542_v16, %v543_v24  ;;  %v556_v33 = vsel %vm485_vm2, %v3233_v15, -inf }
 0x211   :  { %2877 = vpow2.f32 %v622_v27  ;;  %v534_v34 = vmax.f32 %v532_v19, %v533_v28  ;;  %v553_v35 = vmax.f32 %v551_v20, %v552_v17  ;;  %v565_v36 = vmax.f32 %v563_v25, %v564_v29 }
 0x212   :  { %v3248_v38 = vpop.eup %2867  ;;  %v628_v39 = vmul.f32 1.442695, %v605_v31  ;;  %v545_v40 = vrot.slane %v544_v21, 2  ;;  %v557_v41 = vrot.slane %v556_v33, 4  ;;  %v577_v42 = vsel %vm485_vm2, %v3241_v26, -inf  ;;  %v3252_v43 = vpop.f32.mrb[14].mxu1 }
 0x213   :  { %v3254_v44 = vpop.eup %2869  ;;  %v653_v32 = vsel %vm485_vm2, %v3248_v38, 0.0  ;;  %v604_v45 = vsub.f32 %v3221_v37, %v534_v34  ;;  %v554_v46 = vrot.slane %v553_v35, 1  ;;  %v566_v47 = vrot.slane %v565_v36, 2  ;;  %v3259_v48 = vpop.f32.mrb[15].mxu1 }
 0x214   :  { %v654_v49 = vrot.slane %v653_v32, 4  ;;  %v646_v51 = vsel %vm485_vm2, %v3254_v44, 0.0  ;;  %2879 = vpow2.f32 %v628_v39  ;;  %v546_v52 = vmax.f32 %v544_v21, %v545_v40 }
 0x215   :  { %v647_v53 = vrot.slane %v646_v51, 4  ;;  %v626_v54 = vmul.f32 1.442695, %v604_v45  ;;  %v555_v56 = vmax.f32 %v553_v35, %v554_v46  ;;  %v567_v58 = vmax.f32 %v565_v36, %v566_v47 }
 0x216   :  { %v3263_v59 = vpop.eup %2871  ;;  %v3265_v60 = vadd.f32 %v654_v49, %v653_v32  ;;  %v547_v61 = vrot.slane %v546_v52, 1  ;;  %v558_v37 = vmax.f32 %v556_v33, %v557_v41  ;;  %v578_v62 = vrot.slane %v577_v42, 4 }
 0x217   :  { %v3267_v63 = vpop.eup %2873  ;;  %v3269_v0 = vadd.f32 %v647_v53, %v646_v51  ;;  %v667_v2 = vsel %vm485_vm2, %v3263_v59, 0.0  ;;  %2881 = vpow2.f32 %v626_v54  ;;  %v607_v3 = vsub.f32 %v3225_v50, %v555_v56 }
 0x218   :  { %v656_v6 = vrot.slane %v3265_v60, 2  ;;  %v668_v7 = vrot.slane %v667_v2, 4  ;;  %v660_v13 = vsel %vm485_vm2, %v3267_v63, 0.0  ;;  %v548_v14 = vmax.f32 %v546_v52, %v547_v61 }
 0x219   :  { %v649_v1 = vrot.slane %v3269_v0, 2  ;;  %v661_v4 = vrot.slane %v660_v13, 4  ;;  %v632_v16 = vmul.f32 1.442695, %v607_v3  ;;  %v568_v18 = vrot.slane %v567_v58, 1 }
 0x21a   :  { %v3278_v19 = vpop.eup %2875  ;;  %v3280_v20 = vadd.f32 %v668_v7, %v667_v2  ;;  %v606_v22 = vsub.f32 %v3227_v55, %v548_v14  ;;  %v559_v23 = vrot.slane %v558_v37, 2  ;;  %v579_v50 = vmax.f32 %v577_v42, %v578_v62 }
 0x21b   :  { %v3283_v24 = vpop.eup %2877  ;;  %v3285_v25 = vadd.f32 %v661_v4, %v660_v13  ;;  %v681_v27 = vsel %vm485_vm2, %v3278_v19, 0.0  ;;  %2883 = vpow2.f32 %v632_v16  ;;  %v569_v28 = vmax.f32 %v567_v58, %v568_v18 }
 0x21c   :  { %v670_v17 = vrot.slane %v3280_v20, 2  ;;  %v682_v29 = vrot.slane %v681_v27, 4  ;;  %v674_v31 = vsel %vm485_vm2, %v3283_v24, 0.0  ;;  %v630_v21 = vmul.f32 1.442695, %v606_v22 }
 0x21d   :  { %v663_v55 = vrot.slane %v3285_v25, 2  ;;  %v675_v33 = vrot.slane %v674_v31, 4  ;;  %v609_v34 = vsub.f32 %v3231_v5, %v569_v28  ;;  %v560_v35 = vmax.f32 %v558_v37, %v559_v23 }
 0x21e   :  { %v3294_v36 = vpop.eup %2879  ;;  %v3296_v39 = vadd.f32 %v682_v29, %v681_v27  ;;  %2885 = vpow2.f32 %v630_v21  ;;  %v580_v40 = vrot.slane %v579_v50, 2  ;;  %v570_v41 = vsel %vm485_vm2, %v3243_v30, -inf }
 0x21f   :  { %v3300_v42 = vadd.f32 %v675_v33, %v674_v31  ;;  %v695_v32 = vsel %vm485_vm2, %v3294_v36, 0.0  ;;  %v636_v45 = vmul.f32 1.442695, %v609_v34  ;;  %v561_v46 = vrot.slane %v560_v35, 1 }
 0x220   :  { %v684_v47 = vrot.slane %v3296_v39, 2  ;;  %v696_v5 = vrot.slane %v695_v32, 4  ;;  %v581_v49 = vmax.f32 %v579_v50, %v580_v40  ;;  %v571_v51 = vrot.slane %v570_v41, 4 }
 0x221   :  { %v3305_v52 = vpop.eup %2881  ;;  %v677_v53 = vrot.slane %v3300_v42, 2  ;;  %2887 = vpow2.f32 %v636_v45  ;;  %v562_v54 = vmax.f32 %v560_v35, %v561_v46  ;;  %v591_v56 = vsel %vm485_vm2, %v3252_v43, -inf }
 0x222   :  { %v3310_v58 = vadd.f32 %v696_v5, %v695_v32  ;;  %v688_v61 = vsel %vm485_vm2, %v3305_v52, 0.0  ;;  %v582_v37 = vrot.slane %v581_v49, 1  ;;  %v572_v62 = vmax.f32 %v570_v41, %v571_v51 }
 0x223   :  { %v689_v2 = vrot.slane %v688_v61, 4  ;;  %v608_v3 = vsub.f32 %v3233_v15, %v562_v54  ;;  %v592_v7 = vrot.slane %v591_v56, 4  ;;  %v584_v13 = vsel %vm485_vm2, %v3259_v48, -inf }
 0x224   :  { %v698_v14 = vrot.slane %v3310_v58, 2  ;;  %v583_v4 = vmax.f32 %v581_v49, %v582_v37  ;;  %v573_v16 = vrot.slane %v572_v62, 2  ;;  %v585_v18 = vrot.slane %v584_v13, 4 }
 0x225   :  { %v3318_v22 = vpop.eup %2883  ;;  %v3320_v23 = vadd.f32 %v689_v2, %v688_v61  ;;  %v634_v50 = vmul.f32 1.442695, %v608_v3  ;;  %v593_v27 = vmax.f32 %v591_v56, %v592_v7  ;;  %v650_v28 = vadd.f32 %v649_v1, %v3269_v0 }
 0x226   :  { %v709_v15 = vsel %vm485_vm2, %v3318_v22, 0.0  ;;  %v611_v29 = vsub.f32 %v3241_v26, %v583_v4  ;;  %v574_v31 = vmax.f32 %v572_v62, %v573_v16  ;;  %v586_v21 = vmax.f32 %v584_v13, %v585_v18 }
 0x227   :  { %v691_v33 = vrot.slane %v3320_v23, 2  ;;  %v710_v34 = vrot.slane %v709_v15, 4  ;;  %2889 = vpow2.f32 %v634_v50  ;;  %v594_v35 = vrot.slane %v593_v27, 2 }
 0x228   :  { %v3327_v40 = vpop.eup %2885  ;;  %v640_v41 = vmul.f32 1.442695, %v611_v29  ;;  %v575_v32 = vrot.slane %v574_v31, 1  ;;  %v587_v45 = vrot.slane %v586_v21, 2  ;;  %v651_v46 = vrot.slane %v650_v28, 1 }
 0x229   :  { %v3329_v5 = vadd.f32 %v710_v34, %v709_v15  ;;  %v702_v0 = vsel %vm485_vm2, %v3327_v40, 0.0  ;;  %v595_v1 = vmax.f32 %v593_v27, %v594_v35  ;;  %v671_v26 = vadd.f32 %v670_v17, %v3280_v20 }
 0x22a   :  { %v703_v49 = vrot.slane %v702_v0, 4  ;;  %2891 = vpow2.f32 %v640_v41  ;;  %v576_v51 = vmax.f32 %v574_v31, %v575_v32  ;;  %v588_v54 = vmax.f32 %v586_v21, %v587_v45 }
 0x22b   :  { %v3334_v56 = vpop.eup %2887  ;;  %v712_v61 = vrot.slane %v3329_v5, 2  ;;  %v596_v37 = vrot.slane %v595_v1, 1  ;;  %v652_v62 = vadd.f32 %v651_v46, %v650_v28  ;;  %v672_v2 = vrot.slane %v671_v26, 1 }
 0x22c   :  { %v704_v3 = vadd.f32 %v703_v49, %v702_v0  ;;  %v723_v7 = vsel %vm485_vm2, %v3334_v56, 0.0  ;;  %v610_v13 = vsub.f32 %v3243_v30, %v576_v51  ;;  %v589_v4 = vrot.slane %v588_v54, 1 }
 0x22d   :  { %v724_v16 = vrot.slane %v723_v7, 4  ;;  %v597_v20 = vmax.f32 %v595_v1, %v596_v37  ;;  %2893 = vrcp.f32 %v652_v62  ;;  %v673_v17 = vadd.f32 %v672_v2, %v671_v26 }
 0x22e   :  { %v705_v18 = vrot.slane %v704_v3, 2  ;;  %v638_v50 = vmul.f32 1.442695, %v610_v13  ;;  %v590_v27 = vmax.f32 %v588_v54, %v589_v4  ;;  %v657_v15 = vadd.f32 %v656_v6, %v3265_v60 }
 0x22f   :  { %v725_v28 = vadd.f32 %v724_v16, %v723_v7  ;;  %v613_v29 = vsub.f32 %v3252_v43, %v597_v20  ;;  %2895 = vrcp.f32 %v673_v17  ;;  %v664_v30 = vadd.f32 %v663_v55, %v3285_v25 }
 0x230   :  { %2897 = vpow2.f32 %v638_v50  ;;  %v612_v31 = vsub.f32 %v3259_v48, %v590_v27  ;;  %v658_v21 = vrot.slane %v657_v15, 1  ;;  %v678_v34 = vadd.f32 %v677_v53, %v3300_v42 }
 0x231   :  { %v3351_v35 = vpop.eup %2889  ;;  %v726_v41 = vrot.slane %v725_v28, 2  ;;  %v644_v60 = vmul.f32 1.442695, %v613_v29  ;;  %v665_v6 = vrot.slane %v664_v30, 1  ;;  %v685_v43 = vadd.f32 %v684_v47, %v3296_v39 }
 0x232   :  { %v716_v25 = vsel %vm485_vm2, %v3351_v35, 0.0  ;;  %v642_v55 = vmul.f32 1.442695, %v612_v31  ;;  %v659_v32 = vadd.f32 %v658_v21, %v657_v15  ;;  %v679_v48 = vrot.slane %v678_v34, 1 }
 0x233   :  { %v717_v45 = vrot.slane %v716_v25, 4  ;;  %2899 = vpow2.f32 %v644_v60  ;;  %v666_v46 = vadd.f32 %v665_v6, %v664_v30  ;;  %v686_v0 = vrot.slane %v685_v43, 1 }
 0x234   :  { %v3358_v42 = vpop.eup %2891  ;;  %2901 = vpow2.f32 %v642_v55  ;;  %v680_v53 = vadd.f32 %v679_v48, %v678_v34  ;;  %v692_v1 = vadd.f32 %v691_v33, %v3320_v23  ;;  %v699_v39 = vadd.f32 %v698_v14, %v3310_v58 }
 0x235   :  { %v718_v47 = vadd.f32 %v717_v45, %v716_v25  ;;  %v737_v26 = vsel %vm485_vm2, %v3358_v42, 0.0  ;;  %2903 = vrcp.f32 %v659_v32  ;;  %v687_v49 = vadd.f32 %v686_v0, %v685_v43 }
 0x236   :  { %v738_v51 = vrot.slane %v737_v26, 4  ;;  %2905 = vrcp.f32 %v666_v46  ;;  %v693_v54 = vrot.slane %v692_v1, 1  ;;  %v700_v37 = vrot.slane %v699_v39, 1 }
 0x237   :  { %v2894_v62 = vpop.eup %2893  ;;  %v719_v2 = vrot.slane %v718_v47, 2  ;;  %2907 = vrcp.f32 %v680_v53  ;;  %v706_v7 = vadd.f32 %v705_v18, %v704_v3  ;;  %v713_v23 = vadd.f32 %v712_v61, %v3329_v5 }
 0x238   :  { %v739_v33 = vadd.f32 %v738_v51, %v737_v26  ;;  %v774_v13 = vmul.f32 %v2894_v62, %v3254_v44  ;;  %2909 = vrcp.f32 %v687_v49  ;;  %v694_v58 = vadd.f32 %v693_v54, %v692_v1 }
 0x239   :  { %v2896_v14 = vpop.eup %2895  ;;  %v701_v4 = vadd.f32 %v700_v37, %v699_v39  ;;  %v707_v16 = vrot.slane %v706_v7, 1  ;;  %v714_v20 = vrot.slane %v713_v23, 1  ;;  %v720_v17 = vadd.f32 %v719_v2, %v718_v47 }
 0x23a   :  { %v3368_v50 = vpop.eup %2897  ;;  %v740_v27 = vrot.slane %v739_v33, 2  ;;  %822 = vxpose.xlu0.b32.start.end [1/1] (short) (narrow) %v774_v13, 8  ;;  %790 = vst.msk [vmem:[#allocation9] sm:$0xff] %vm485_vm2, %v774_v13  ;;  %v777_v3 = vmul.f32 %v2896_v14, %v3263_v59  ;;  %2911 = vrcp.f32 %v694_v58  ;;  %v727_v5 = vadd.f32 %v726_v41, %v725_v28 }
 0x23b   :  { %v730_v44 = vsel %vm485_vm2, %v3368_v50, 0.0  ;;  %2913 = vrcp.f32 %v701_v4  ;;  %v708_v61 = vadd.f32 %v707_v16, %v706_v7  ;;  %v715_v18 = vadd.f32 %v714_v20, %v713_v23 }
 0x23c   :  { %v731_v15 = vrot.slane %v730_v44, 4  ;;  %1138 = vxpose.xlu1.b32.start.end [1/1] (short) (narrow) %v777_v3, 8  ;;  %793 = vst.msk [vmem:[#allocation9 + $0x18] sm:$0xff] %vm485_vm2, %v777_v3  ;;  %v721_v29 = vrot.slane %v720_v17, 1  ;;  %v728_v30 = vrot.slane %v727_v5, 1  ;;  %v741_v31 = vadd.f32 %v740_v27, %v739_v33 }
 0x23d   :  { %v3375_v21 = vpop.eup %2899  ;;  %2915 = vrcp.f32 %v708_v61 }
 0x23e   :  { %v3377_v34 = vpop.eup %2901  ;;  %v732_v59 = vadd.f32 %v731_v15, %v730_v44  ;;  %v751_v28 = vsel %vm485_vm2, %v3375_v21, 0.0  ;;  %2917 = vrcp.f32 %v715_v18  ;;  %v722_v41 = vadd.f32 %v721_v29, %v720_v17 }
 0x23f   :  { %v2904_v60 = vpop.eup %2903  ;;  %v752_v6 = vrot.slane %v751_v28, 4  ;;  %v744_v43 = vsel %vm485_vm2, %v3377_v34, 0.0  ;;  %v729_v25 = vadd.f32 %v728_v30, %v727_v5  ;;  %v742_v55 = vrot.slane %v741_v31, 1 }
 0x240   :  { %v2906_v32 = vpop.eup %2905  ;;  %v733_v48 = vrot.slane %v732_v59, 2  ;;  %v745_v45 = vrot.slane %v744_v43, 4  ;;  %v775_v46 = vmul.f32 %v2904_v60, %v3248_v38  ;;  %2919 = vrcp.f32 %v722_v41 }
 0x241   :  { %v2908_v0 = vpop.eup %2907  ;;  %v753_v53 = vadd.f32 %v752_v6, %v751_v28  ;;  %v776_v1 = vmul.f32 %v2906_v32, %v3267_v63  ;;  %2921 = vrcp.f32 %v729_v25  ;;  %v743_v39 = vadd.f32 %v742_v55, %v741_v31  ;;  %v2934_v28 = vld [vmem:[#allocation2 + $0x50] sm:$0xff]  ;;  %v2935_v6 = vld [vmem:[#allocation2 + $0x58] sm:$0xff]  ;;  %v2937_v32 = vld [vmem:[#allocation2 + $0x68] sm:$0xff] }
 0x242   :  { %v2910_v47 = vpop.eup %2909  ;;  %v746_v26 = vadd.f32 %v745_v45, %v744_v43  ;;  %791 = vst.msk [vmem:[#allocation9 + $0x8] sm:$0xff] %vm485_vm2, %v775_v46  ;;  %928 = vxpose.xlu0.b32.start.end [1/1] (short) (narrow) %v775_v46, 8  ;;  %v778_v49 = vmul.f32 %v2908_v0, %v3283_v24  ;;  %v734_v51 = vadd.f32 %v733_v48, %v732_v59  ;;  %v2933_v59 = vld [vmem:[#allocation2 + $0x48] sm:$0xff]  ;;  %v2936_v43 = vld [vmem:[#allocation2 + $0x60] sm:$0xff]  ;;  %v2938_v48 = vld [vmem:[#allocation2 + $0x70] sm:$0xff] }
 0x243   :  { %v754_v54 = vrot.slane %v753_v53, 2  ;;  %1033 = vxpose.xlu1.b32.start.end [1/1] (short) (narrow) %v776_v1, 8  ;;  %792 = vst.msk [vmem:[#allocation9 + $0x10] sm:$0xff] %vm485_vm2, %v776_v1  ;;  %v779_v38 = vmul.f32 %v2910_v47, %v3278_v19  ;;  %2923 = vrcp.f32 %v743_v39  ;;  %v2939_v46 = vld [vmem:[#allocation2 + $0x78] sm:$0xff] }
 0x244   :  { %v2912_v37 = vpop.eup %2911  ;;  %v747_v62 = vrot.slane %v746_v26, 2  ;;  %794 = vst.msk [vmem:[#allocation9 + $0x20] sm:$0xff] %vm485_vm2, %v778_v49  ;;  %v735_v63 = vrot.slane %v734_v51, 1 }
 0x245   :  { %v2914_v2 = vpop.eup %2913  ;;  %795 = vst.msk [vmem:[#allocation9 + $0x28] sm:$0xff] %vm485_vm2, %v779_v38  ;;  %v780_v7 = vmul.f32 %v2912_v37, %v3305_v52  ;;  %v755_v23 = vadd.f32 %v754_v54, %v753_v53 }
 0x246   :  { %1243 = vxpose.xlu0.b32.start.end [1/1] (short) (narrow) %v778_v49, 8  ;;  %v781_v24 = vmul.f32 %v2914_v2, %v3294_v36  ;;  %v736_v33 = vadd.f32 %v735_v63, %v734_v51  ;;  %v748_v13 = vadd.f32 %v747_v62, %v746_v26 }
 0x247   :  { %v2916_v58 = vpop.eup %2915  ;;  %1348 = vxpose.xlu1.b32.start.end [1/1] (short) (narrow) %v779_v38, 8  ;;  %796 = vst.msk [vmem:[#allocation9 + $0x30] sm:$0xff] %vm485_vm2, %v780_v7  ;;  %v756_v19 = vrot.slane %v755_v23, 1 }
 0x248   :  { %v2918_v14 = vpop.eup %2917  ;;  %797 = vst.msk [vmem:[#allocation9 + $0x38] sm:$0xff] %vm485_vm2, %v781_v24  ;;  %v782_v4 = vmul.f32 %v2916_v58, %v3327_v40  ;;  %2925 = vrcp.f32 %v736_v33  ;;  %v749_v16 = vrot.slane %v748_v13, 1 }
 0x249   :  { %v783_v52 = vmul.f32 %v2918_v14, %v3318_v22  ;;  %v757_v20 = vadd.f32 %v756_v19, %v755_v23 }
 0x24a   :  { %v2920_v17 = vpop.eup %2919  ;;  %1453 = vxpose.xlu0.b32.start.end [1/1] (short) (narrow) %v780_v7, 8  ;;  %798 = vst.msk [vmem:[#allocation9 + $0x40] sm:$0xff] %vm485_vm2, %v782_v4  ;;  %v750_v36 = vadd.f32 %v749_v16, %v748_v13 }
 0x24b   :  { %v2922_v27 = vpop.eup %2921  ;;  %1558 = vxpose.xlu1.b32.start.end [1/1] (short) (narrow) %v781_v24, 8  ;;  %799 = vst.msk [vmem:[#allocation9 + $0x48] sm:$0xff] %vm485_vm2, %v783_v52  ;;  %v784_v3 = vmul.f32 %v2920_v17, %v3351_v35  ;;  %2927 = vrcp.f32 %v757_v20 }
 0x24c   :  { %v785_v5 = vmul.f32 %v2922_v27, %v3334_v56  ;;  %2929 = vrcp.f32 %v750_v36 }
 0x24d   :  { %v2924_v40 = vpop.eup %2923  ;;  %800 = vst.msk [vmem:[#allocation9 + $0x50] sm:$0xff] %vm485_vm2, %v784_v3 }
 0x24e   :  { %1663 = vxpose.xlu0.b32.start.end [1/1] (short) (narrow) %v782_v4, 8  ;;  %801 = vst.msk [vmem:[#allocation9 + $0x58] sm:$0xff] %vm485_vm2, %v785_v5  ;;  %v787_v22 = vmul.f32 %v2924_v40, %v3358_v42 }
 0x24f   :  { %1768 = vxpose.xlu1.b32.start.end [1/1] (short) (narrow) %v783_v52, 8 }
 0x250   :  { %803 = vst.msk [vmem:[#allocation9 + $0x68] sm:$0xff] %vm485_vm2, %v787_v22 }
 0x252   :  { %v2926_v44 = vpop.eup %2925  ;;  %1873 = vxpose.xlu0.b32.start.end [1/1] (short) (narrow) %v784_v3, 8 }
 0x253   :  { %1978 = vxpose.xlu1.b32.start.end [1/1] (short) (narrow) %v785_v5, 8  ;;  %v786_v35 = vmul.f32 %v2926_v44, %v3368_v50 }
 0x255   :  { %v2928_v61 = vpop.eup %2927  ;;  %802 = vst.msk [vmem:[#allocation9 + $0x60] sm:$0xff] %vm485_vm2, %v786_v35 }
 0x256   :  { %v2930_v56 = vpop.eup %2929  ;;  %2083 = vxpose.xlu0.b32.start.end [1/1] (short) (narrow) %v786_v35, 8  ;;  %v789_v18 = vmul.f32 %v2928_v61, %v3375_v21  ;;  %v2931_v21 = vld [vmem:[#allocation2 + $0x38] sm:$0xff] }
 0x257   :  { %2188 = vxpose.xlu1.b32.start.end [1/1] (short) (narrow) %v787_v22, 8  ;;  %v788_v15 = vmul.f32 %v2930_v56, %v3377_v34 }
 0x258   :  { %805 = vst.msk [vmem:[#allocation9 + $0x78] sm:$0xff] %vm485_vm2, %v789_v18 }
 0x259   :  { %804 = vst.msk [vmem:[#allocation9 + $0x70] sm:$0xff] %vm485_vm2, %v788_v15 }
 0x25a   :  { %2293 = vxpose.xlu0.b32.start.end [1/1] (short) (narrow) %v788_v15, 8 }
 0x25b   :  { %2398 = vxpose.xlu1.b32.start.end [1/1] (short) (narrow) %v789_v18, 8 }
 0x2ba   :  { %v838_v42 = vpop.trf.xlu0 }
 0x2bb   :  { %2735 = vmatmul.mubr.msk.f32.vlgmr.msra.gmra.mrb[16].mxu1 %vm854_vm4, %v838_v42 }
 0x2bc   :  { %2743 = vmatpush3.msra.mxu1 %v3152_v8  ;;  %2744 = vmatprep.mubr.msk.f32.mxu1 %vm3064_vm3, %v3063_v57  ;;  %v1154_v50 = vpop.trf.xlu1 }
 0x2bd   :  { %2752 = vmatprep.subr.mxu1 %v3063_v57 }
 0x2c2   :  { %v944_v29 = vpop.trf.xlu0 }
 0x2c3   :  { %2740 = vmatmul.mubr.msk.f32.vlgmr.msra.gmra.mrb[16].mxu0 %vm854_vm4, %v944_v29  ;;  %v1049_v30 = vpop.trf.xlu1 }
 0x2c4   :  { %2748 = vmatpush3.msra.mxu0 %v3158_v9  ;;  %2745 = vmatmul.mubr.msk.f32.vlgmr.msra.gmra.mrb[18].mxu1 %vm854_vm4, %v1049_v30 }
 0x2c5   :  { %2749 = vmatprep.mubr.msk.f32.mxu0 %vm3064_vm3, %v3063_v57  ;;  %2757 = vmatprep.subr.mxu0 %v3063_v57 }
 0x2c6   :  { %2753 = vmatpush3.msra.mxu1 %v3160_v10  ;;  %v1259_v8 = vpop.trf.xlu0  ;;  %2754 = vmatprep.mubr.msk.f32.mxu1 %vm3064_vm3, %v3063_v57 }
 0x2c7   :  { %2750 = vmatmul.mubr.msk.f32.vlgmr.msra.gmra.mrb[18].mxu0 %vm854_vm4, %v1154_v50  ;;  %v1364_v31 = vpop.trf.xlu1  ;;  %2762 = vmatprep.subr.mxu1 %v3063_v57 }
 0x2c8   :  { %2758 = vmatpush3.msra.mxu0 %v3166_v11  ;;  %2759 = vmatprep.mubr.msk.f32.mxu0 %vm3064_vm3, %v3063_v57  ;;  %v2932_v11 = vld [vmem:[#allocation2 + $0x40] sm:$0xff] }
 0x2c9   :  { %2767 = vmatprep.subr.mxu0 %v3063_v57  ;;  %2755 = vmatmul.mubr.msk.f32.vlgmr.msra.gmra.mrb[20].mxu1 %vm854_vm4, %v1259_v8 }
 0x2ca   :  { %2763 = vmatpush3.msra.mxu1 %v3168_v12  ;;  %v1469_v9 = vpop.trf.xlu0  ;;  %2764 = vmatprep.mubr.msk.f32.mxu1 %vm3064_vm3, %v3063_v57 }
 0x2cb   :  { %2760 = vmatmul.mubr.msk.f32.vlgmr.msra.gmra.mrb[20].mxu0 %vm854_vm4, %v1364_v31  ;;  %v1574_v10 = vpop.trf.xlu1  ;;  %2772 = vmatprep.subr.mxu1 %v3063_v57 }
 0x2cc   :  { %2768 = vmatpush3.msra.mxu0 %v2931_v21  ;;  %2769 = vmatprep.mubr.msk.f32.mxu0 %vm3064_vm3, %v3063_v57 }
 0x2cd   :  { %2777 = vmatprep.subr.mxu0 %v3063_v57  ;;  %2765 = vmatmul.mubr.msk.f32.vlgmr.msra.gmra.mrb[22].mxu1 %vm854_vm4, %v1469_v9 }
 0x2ce   :  { %2773 = vmatpush3.msra.mxu1 %v2932_v11  ;;  %v1679_v12 = vpop.trf.xlu0  ;;  %2774 = vmatprep.mubr.msk.f32.mxu1 %vm3064_vm3, %v3063_v57 }
 0x2cf   :  { %2770 = vmatmul.mubr.msk.f32.vlgmr.msra.gmra.mrb[22].mxu0 %vm854_vm4, %v1574_v10  ;;  %v1784_v34 = vpop.trf.xlu1  ;;  %2782 = vmatprep.subr.mxu1 %v3063_v57 }
 0x2d0   :  { %2778 = vmatpush3.msra.mxu0 %v2933_v59  ;;  %2779 = vmatprep.mubr.msk.f32.mxu0 %vm3064_vm3, %v3063_v57 }
 0x2d1   :  { %2787 = vmatprep.subr.mxu0 %v3063_v57  ;;  %2775 = vmatmul.mubr.msk.f32.vlgmr.msra.gmra.mrb[24].mxu1 %vm854_vm4, %v1679_v12 }
 0x2d2   :  { %2783 = vmatpush3.msra.mxu1 %v2934_v28  ;;  %v1889_v41 = vpop.trf.xlu0  ;;  %2784 = vmatprep.mubr.msk.f32.mxu1 %vm3064_vm3, %v3063_v57 }
 0x2d3   :  { %2780 = vmatmul.mubr.msk.f32.vlgmr.msra.gmra.mrb[24].mxu0 %vm854_vm4, %v1784_v34  ;;  %v1994_v60 = vpop.trf.xlu1  ;;  %2792 = vmatprep.subr.mxu1 %v3063_v57 }
 0x2d4   :  { %2788 = vmatpush3.msra.mxu0 %v2935_v6  ;;  %2789 = vmatprep.mubr.msk.f32.mxu0 %vm3064_vm3, %v3063_v57 }
 0x2d5   :  { %2797 = vmatprep.subr.mxu0 %v3063_v57  ;;  %2785 = vmatmul.mubr.msk.f32.vlgmr.msra.gmra.mrb[26].mxu1 %vm854_vm4, %v1889_v41 }
 0x2d6   :  { %2793 = vmatpush3.msra.mxu1 %v2936_v43  ;;  %v2099_v25 = vpop.trf.xlu0  ;;  %2794 = vmatprep.mubr.msk.f32.mxu1 %vm3064_vm3, %v3063_v57 }
 0x2d7   :  { %2790 = vmatmul.mubr.msk.f32.vlgmr.msra.gmra.mrb[26].mxu0 %vm854_vm4, %v1994_v60  ;;  %v2204_v55 = vpop.trf.xlu1  ;;  %2802 = vmatprep.subr.mxu1 %v3063_v57 }
 0x2d8   :  { %2798 = vmatpush3.msra.mxu0 %v2937_v32  ;;  %2799 = vmatprep.mubr.msk.f32.mxu0 %vm3064_vm3, %v3063_v57 }
 0x2d9   :  { %2807 = vmatprep.subr.mxu0 %v3063_v57  ;;  %2795 = vmatmul.mubr.msk.f32.vlgmr.msra.gmra.mrb[28].mxu1 %vm854_vm4, %v2099_v25 }
 0x2da   :  { %2803 = vmatpush3.msra.mxu1 %v2938_v48  ;;  %2804 = vmatprep.mubr.msk.f32.mxu1 %vm3064_vm3, %v3063_v57  ;;  %v2309_v45 = vpop.trf.xlu0 }
 0x2db   :  { %2800 = vmatmul.mubr.msk.f32.vlgmr.msra.gmra.mrb[28].mxu0 %vm854_vm4, %v2204_v55  ;;  %v2414_v0 = vpop.trf.xlu1 }
 0x2dc   :  { %2808 = vmatpush3.msra.mxu0 %v2939_v46  ;;  %2809 = vmatprep.mubr.msk.f32.mxu0 %vm3064_vm3, %v3063_v57 }
 0x2dd   :  { %2805 = vmatmul.mubr.msk.f32.vlgmr.msra.gmra.mrb[30].mxu1 %vm854_vm4, %v2309_v45 }
 0x2df   :  { %2810 = vmatmul.mubr.msk.f32.vlgmr.msra.gmra.mrb[30].mxu0 %vm854_vm4, %v2414_v0 }
 0x2e0   :  { %3017 = shalt.err (!%p3014_p0)
}
 0x2e1   :  { %s3018_s5 = scalar_lea.hbm %s3523_s4, 2048 }
 0x2e2   :  { %p3019_p1 = scmp.ne.s32.totalorder %s3523_s4, %s3018_s5  ;;  %p3022_p2 = scmp.lt.u32.totalorder %s3018_s5, %s3523_s4 }
 0x2e4   :  { %p3024_p3 = pnand %p3022_p2, %p3019_p1 }
 0x2e6   :  { %3027 = shalt.err (!%p3024_p3)
}
 0x2e7   :  { %2543 = dma.vmem_to_hbm [thread:$0]  %s2538_s25, 2048, %s3523_s4, [#allocation10], %s3060_s27, %s3060_s27, %s3061_s28   ;;  %vm2503_vm5 = vcmask 257024  }
 0x2e8   :  { %s3066_s4 = smov [#allocation8]  }
 0x2e9   :  { %s2525_s27 = sshll.u32 %s3066_s4, 4  ;;  %s2526_s27 = int_to_ptr.vmem [resolvable:$true] %s2525_s27 }
 0x2ea   :  { %s3028_s28 = scalar_lea.vmem %s2526_s27, 1024  ;;  %p3033_p5 = scmp.lt.s32.totalorder %s2526_s27, %s2526_s27 }
 0x2eb   :  { %p3029_p4 = scmp.ne.s32.totalorder %s2526_s27, %s3028_s28  ;;  %p3034_p6 = scmp.lt.s32.totalorder %s3028_s28, %s3028_s28 }
 0x2ed   :  { %p3035_p7 = por %p3034_p6, %p3033_p5 }
 0x2ef   :  { %p3036_p8 = pnand %p3035_p7, %p3029_p4 }
 0x38e   :  { %v924_v57 = vpop.f32.mrb[16].mxu1 }
 0x38f   :  { %2504 = vst.msk [vmem:[#allocation8] sm:$0xf] %vm2503_vm5, %v924_v57  ;;  %v2736_v53 = vpop.f32.mrb[17].mxu1 }
 0x396   :  { %v1029_v1 = vpop.f32.mrb[16].mxu0 }
 0x397   :  { %2505 = vst.msk [vmem:[#allocation8 + $0x4] sm:$0xf] %vm2503_vm5, %v1029_v1  ;;  %v2741_v39 = vpop.f32.mrb[17].mxu0  ;;  %v1134_v47 = vpop.f32.mrb[18].mxu1 }
 0x398   :  { %2506 = vst.msk [vmem:[#allocation8 + $0x8] sm:$0xf] %vm2503_vm5, %v1134_v47  ;;  %v2746_v26 = vpop.f32.mrb[19].mxu1 }
 0x39a   :  { %v1239_v49 = vpop.f32.mrb[18].mxu0 }
 0x39b   :  { %2507 = vst.msk [vmem:[#allocation8 + $0xc] sm:$0xf] %vm2503_vm5, %v1239_v49  ;;  %v2751_v51 = vpop.f32.mrb[19].mxu0 }
 0x39c   :  { %v1344_v54 = vpop.f32.mrb[20].mxu1 }
 0x39d   :  { %2508 = vst.msk [vmem:[#allocation8 + $0x10] sm:$0xf] %vm2503_vm5, %v1344_v54  ;;  %v2756_v38 = vpop.f32.mrb[21].mxu1 }
 0x39e   :  { %v1449_v37 = vpop.f32.mrb[20].mxu0 }
 0x39f   :  { %2509 = vst.msk [vmem:[#allocation8 + $0x14] sm:$0xf] %vm2503_vm5, %v1449_v37  ;;  %v2761_v62 = vpop.f32.mrb[21].mxu0 }
 0x3a0   :  { %v1554_v63 = vpop.f32.mrb[22].mxu1 }
 0x3a1   :  { %2510 = vst.msk [vmem:[#allocation8 + $0x18] sm:$0xf] %vm2503_vm5, %v1554_v63  ;;  %v2766_v2 = vpop.f32.mrb[23].mxu1 }
 0x3a2   :  { %v1659_v7 = vpop.f32.mrb[22].mxu0 }
 0x3a3   :  { %2511 = vst.msk [vmem:[#allocation8 + $0x1c] sm:$0xf] %vm2503_vm5, %v1659_v7  ;;  %v2771_v23 = vpop.f32.mrb[23].mxu0 }
 0x3a4   :  { %v1764_v24 = vpop.f32.mrb[24].mxu1 }
 0x3a5   :  { %2512 = vst.msk [vmem:[#allocation8 + $0x20] sm:$0xf] %vm2503_vm5, %v1764_v24  ;;  %v2776_v33 = vpop.f32.mrb[25].mxu1 }
 0x3a6   :  { %v1869_v13 = vpop.f32.mrb[24].mxu0 }
 0x3a7   :  { %2513 = vst.msk [vmem:[#allocation8 + $0x24] sm:$0xf] %vm2503_vm5, %v1869_v13  ;;  %v2781_v58 = vpop.f32.mrb[25].mxu0 }
 0x3a8   :  { %v1974_v19 = vpop.f32.mrb[26].mxu1 }
 0x3a9   :  { %2514 = vst.msk [vmem:[#allocation8 + $0x28] sm:$0xf] %vm2503_vm5, %v1974_v19  ;;  %v2786_v14 = vpop.f32.mrb[27].mxu1 }
 0x3aa   :  { %v2079_v4 = vpop.f32.mrb[26].mxu0 }
 0x3ab   :  { %2515 = vst.msk [vmem:[#allocation8 + $0x2c] sm:$0xf] %vm2503_vm5, %v2079_v4  ;;  %v2791_v16 = vpop.f32.mrb[27].mxu0 }
 0x3ac   :  { %v2184_v52 = vpop.f32.mrb[28].mxu1 }
 0x3ad   :  { %2516 = vst.msk [vmem:[#allocation8 + $0x30] sm:$0xf] %vm2503_vm5, %v2184_v52  ;;  %v2796_v20 = vpop.f32.mrb[29].mxu1 }
 0x3ae   :  { %v2289_v17 = vpop.f32.mrb[28].mxu0 }
 0x3af   :  { %2517 = vst.msk [vmem:[#allocation8 + $0x34] sm:$0xf] %vm2503_vm5, %v2289_v17  ;;  %v2801_v36 = vpop.f32.mrb[29].mxu0 }
 0x3b0   :  { %v2394_v27 = vpop.f32.mrb[30].mxu1 }
 0x3b1   :  { %2518 = vst.msk [vmem:[#allocation8 + $0x38] sm:$0xf] %vm2503_vm5, %v2394_v27  ;;  %v2806_v3 = vpop.f32.mrb[31].mxu1 }
 0x3b2   :  { %v2499_v5 = vpop.f32.mrb[30].mxu0 }
 0x3b3   :  { %2519 = vst.msk [vmem:[#allocation8 + $0x3c] sm:$0xf] %vm2503_vm5, %v2499_v5  ;;  %v2811_v40 = vpop.f32.mrb[31].mxu0 }
 0x3b4   :  { %3039 = shalt.err (!%p3036_p8)
}
 0x3b5   :  { %s3040_s13 = scalar_lea.hbm %s3522_s3, 1024 }
 0x3b6   :  { %p3041_p9 = scmp.ne.s32.totalorder %s3522_s3, %s3040_s13  ;;  %p3044_p10 = scmp.lt.u32.totalorder %s3040_s13, %s3522_s3 }
 0x3b8   :  { %p3046_p11 = pnand %p3044_p10, %p3041_p9 }
 0x3ba   :  { %3049 = shalt.err (!%p3046_p11)
}
 0x3bb   :  { %s3067_s19 = smov 64   ;;  %s3068_s20 = smov 4  }
 0x3bc   :  { %2531 = dma.vmem_to_hbm [thread:$0]  %s2526_s27, 1024, %s3522_s3, [#allocation4], %s3067_s19, %s3067_s19, %s3068_s20  }
 0x3bd   :  { %3054 = dma.done.wait [#allocation4], 1024  }
 0x3be   :  { %3055 = vsyncadd [#allocation4], 4294966272 }
 0x3bf   :  { %3056 = dma.done.wait [#allocation10], 2048  }
 0x3c0   :  { %3057 = vsyncadd [#allocation10], 4294965248 }
 0x3c1   :  { %2550 = vsyncpa [#allocation3], 1 }
 0x3c2   :  { %2551 = vsyncpa [#allocation6], 1 }
 0x3c3   :  { %2552 = vsyncpa [#allocation4], 1 }
 0x3c4   :  { %2553 = vsyncpa [#allocation10], 1 }

// kernel: tpu_custom_call.1
= control target key start
LH: loop header
LB: loop body
LE: loop exit
PB: predicated region body
PF: predicated region fallthrough
CT: control target
= control target key end

     0   :  { %10 = vsyncpa [#allocation3], 0  ;;  %s3519_s0 = inlined_call_operand.hbm [shape: f32[16,8,32], index: 0, kind: input, shape index: {}]   ;;  %s3520_s1 = inlined_call_operand.hbm [shape: f32[32,16], index: 1, kind: input, shape index: {}]   ;;  %s3521_s2 = inlined_call_operand.hbm [shape: f32[16,4], index: 2, kind: input, shape index: {}]   ;;  %s3522_s3 = inlined_call_operand.hbm [shape: f32[16,4,32], index: 3, kind: output, shape index: {0}]   ;;  %s3523_s4 = inlined_call_operand.hbm [shape: f32[16,8,4], index: 4, kind: output, shape index: {1}]  }
   0x1   :  { %11 = vsyncpa [#allocation6], 0 }
   0x2   :  { %12 = vsyncpa [#allocation4], 0 }
   0x3   :  { %13 = vsyncpa [#allocation10], 0  ;;  %s3058_s15 = smov [#allocation5]   ;;  %s3059_s17 = smov [#allocation2]  }
   0x4   :  { %s31_s16 = sshll.u32 %s3058_s15, 4  ;;  %s19_s18 = sshll.u32 %s3059_s17, 4  ;;  %s32_s16 = int_to_ptr.vmem [resolvable:$true] %s31_s16  ;;  %s3094_s18 = int_to_ptr.vmem [resolvable:$true] %s19_s18 }
   0x5   :  { %s2940_s21 = scalar_lea.hbm %s3520_s1, 512 }
   0x6   :  { %p2941_p0 = scmp.ne.s32.totalorder %s3520_s1, %s2940_s21  ;;  %p2944_p1 = scmp.lt.u32.totalorder %s2940_s21, %s3520_s1 }
   0x8   :  { %p2946_p2 = pnand %p2944_p1, %p2941_p0 }
   0xa   :  { %2949 = shalt.err (!%p2946_p2)
}
   0xb   :  { %s2950_s26 = scalar_lea.vmem %s32_s16, 512  ;;  %p2955_p4 = scmp.lt.s32.totalorder %s32_s16, %s32_s16 }
   0xc   :  { %p2951_p3 = scmp.ne.s32.totalorder %s32_s16, %s2950_s26  ;;  %p2956_p5 = scmp.lt.s32.totalorder %s2950_s26, %s2950_s26 }
   0xe   :  { %p2957_p6 = por %p2956_p5, %p2955_p4 }
  0x10   :  { %p2958_p7 = pnand %p2957_p6, %p2951_p3 }
  0x12   :  { %2961 = shalt.err (!%p2958_p7)
}
  0x13   :  { %s3060_s27 = smov 128   ;;  %s3061_s28 = smov 8  }
  0x14   :  { %37 = dma.hbm_to_vmem [thread:$0]  %s3520_s1, 512, %s32_s16, [#allocation6], %s3060_s27, %s3060_s27, %s3061_s28  }
  0x15   :  { %s2962_s7 = scalar_lea.hbm %s3519_s0, 2048 }
  0x16   :  { %p2963_p8 = scmp.ne.s32.totalorder %s3519_s0, %s2962_s7  ;;  %p2966_p9 = scmp.lt.u32.totalorder %s2962_s7, %s3519_s0 }
  0x18   :  { %p2968_p10 = pnand %p2966_p9, %p2963_p8 }
  0x1a   :  { %2971 = shalt.err (!%p2968_p10)
}
  0x1b   :  { %s2972_s12 = scalar_lea.vmem %s3094_s18, 2048  ;;  %p2977_p12 = scmp.lt.s32.totalorder %s3094_s18, %s3094_s18 }
  0x1c   :  { %p2973_p11 = scmp.ne.s32.totalorder %s3094_s18, %s2972_s12  ;;  %p2978_p13 = scmp.lt.s32.totalorder %s2972_s12, %s2972_s12 }
  0x1e   :  { %p2979_p0 = por %p2978_p13, %p2977_p12 }
  0x20   :  { %p2980_p1 = pnand %p2979_p0, %p2973_p11 }
  0x22   :  { %2983 = shalt.err (!%p2980_p1)
}
  0x23   :  { %25 = dma.hbm_to_vmem [thread:$0]  %s3519_s0, 2048, %s3094_s18, [#allocation3], %s3060_s27, %s3060_s27, %s3061_s28  }
  0x24   :  { %s3062_s14 = smov [#allocation7]   ;;  %s2984_s19 = scalar_lea.hbm %s3521_s2, 256 }
  0x25   :  { %s43_s15 = sshll.u32 %s3062_s14, 4  ;;  %p2985_p2 = scmp.ne.s32.totalorder %s3521_s2, %s2984_s19  ;;  %s44_s15 = int_to_ptr.vmem [resolvable:$true] %s43_s15 }
  0x26   :  { %p2988_p3 = scmp.lt.u32.totalorder %s2984_s19, %s3521_s2 }
  0x28   :  { %p2990_p4 = pnand %p2988_p3, %p2985_p2 }
  0x2a   :  { %2993 = shalt.err (!%p2990_p4)
}
  0x2b   :  { %s2994_s24 = scalar_lea.vmem %s44_s15, 256  ;;  %p2999_p6 = scmp.lt.s32.totalorder %s44_s15, %s44_s15 }
  0x2c   :  { %p2995_p5 = scmp.ne.s32.totalorder %s44_s15, %s2994_s24  ;;  %p3000_p7 = scmp.lt.s32.totalorder %s2994_s24, %s2994_s24 }
  0x2e   :  { %p3001_p8 = por %p3000_p7, %p2999_p6 }
  0x30   :  { %p3002_p9 = pnand %p3001_p8, %p2995_p5 }
  0x32   :  { %3005 = shalt.err (!%p3002_p9)
}
  0x33   :  { %49 = dma.hbm_to_vmem [thread:$0]  %s3521_s2, 256, %s44_s15, [#allocation6], %s3060_s27, %s3060_s27, %s3061_s28  }
  0x34   :  { %3050 = dma.done.wait [#allocation3], 2048  }
  0x35   :  { %3051 = vsyncadd [#allocation3], 4294965248 }
  0x36   :  { %3052 = dma.done.wait [#allocation6], 768  }
  0x37   :  { %3053 = vsyncadd [#allocation6], 4294966528  ;;  %vm79_vm0 = vcmask 261120   ;;  %v75_v0 = vld [vmem:[#allocation5] sm:$0xff]  ;;  %v76_v1 = vld [vmem:[#allocation5 + $0x8] sm:$0xff]  ;;  %vm291_vm1 = vcmask 130048  }
  0x38   :  { %v77_v2 = vld [vmem:[#allocation5 + $0x10] sm:$0xff]  ;;  %v2812_v3 = vpack.c.bf16 %v76_v1, %v75_v0  ;;  %v78_v4 = vld [vmem:[#allocation5 + $0x18] sm:$0xff]  ;;  %v3146_v5 = vld [vmem:[#allocation2] sm:$0xff]  ;;  %v3063_v57 = vmov 0.0   ;;  %vm485_vm2 = vcmask 31744   ;;  %vm3064_vm3 = vmmov 0  }
  0x39   :  { %v2816_v6 = vpack.c.bf16 %v78_v4, %v77_v2  ;;  %2680 = vmatprep.mubr.msk.f32.mxu0 %vm79_vm0, %v3146_v5  ;;  %v3150_v7 = vld [vmem:[#allocation2 + $0x8] sm:$0xff]  ;;  %v3152_v8 = vld [vmem:[#allocation2 + $0x10] sm:$0xff]  ;;  %v3158_v9 = vld [vmem:[#allocation2 + $0x18] sm:$0xff]  ;;  %vm854_vm4 = vcmask 64512   ;;  %s3065_s2 = smov [#allocation9]  }
  0x3a   :  { %2813 = vmatprep.subr.bf16.mxu0 %v2812_v3  ;;  %v3160_v10 = vld [vmem:[#allocation2 + $0x20] sm:$0xff]  ;;  %v3166_v11 = vld [vmem:[#allocation2 + $0x28] sm:$0xff]  ;;  %v3168_v12 = vld [vmem:[#allocation2 + $0x30] sm:$0xff]  ;;  %s2537_s25 = sshll.u32 %s3065_s2, 4  ;;  %s2538_s25 = int_to_ptr.vmem [resolvable:$true] %s2537_s25 }
  0x3b   :  { %2815 = vmatpush3.bf16.msra.mxu0 %v2812_v3  ;;  %v66_v13 = vld [vmem:[#allocation2 + $0x38] sm:$0xff]  ;;  %v67_v14 = vld [vmem:[#allocation2 + $0x40] sm:$0xff]  ;;  %v68_v15 = vld [vmem:[#allocation2 + $0x48] sm:$0xff]  ;;  %s3006_s26 = scalar_lea.vmem %s2538_s25, 2048  ;;  %p3011_p11 = scmp.lt.s32.totalorder %s2538_s25, %s2538_s25 }
  0x3c   :  { %2817 = vmatprep.subr.bf16.mxu0 %v2816_v6  ;;  %v69_v16 = vld [vmem:[#allocation2 + $0x50] sm:$0xff]  ;;  %v70_v17 = vld [vmem:[#allocation2 + $0x58] sm:$0xff]  ;;  %v71_v18 = vld [vmem:[#allocation2 + $0x60] sm:$0xff]  ;;  %p3007_p10 = scmp.ne.s32.totalorder %s2538_s25, %s3006_s26  ;;  %p3012_p12 = scmp.lt.s32.totalorder %s3006_s26, %s3006_s26 }
  0x3d   :  { %v72_v19 = vld [vmem:[#allocation2 + $0x68] sm:$0xff]  ;;  %v73_v20 = vld [vmem:[#allocation2 + $0x70] sm:$0xff]  ;;  %v74_v21 = vld [vmem:[#allocation2 + $0x78] sm:$0xff] }
  0x3e   :  { %v289_v22 = vld [vmem:[#allocation7] sm:$0xff]  ;;  %v290_v23 = vld [vmem:[#allocation7 + $0x8] sm:$0xff]  ;;  %p3013_p13 = por %p3012_p12, %p3011_p11 }
  0x3f   :  { %2819 = vmatpush3.bf16.msra.mxu0 %v2816_v6  ;;  %v2820_v24 = vpack.c.bf16 %v290_v23, %v289_v22 }
  0x40   :  { %2737 = vmatprep.subr.mxu0 %v3063_v57  ;;  %p3014_p0 = pnand %p3013_p13, %p3007_p10 }
  0x41   :  { %2821 = vmatprep.subr.bf16.mxu1 %v2820_v24 }
  0x42   :  { %2681 = vmatmul.mubr.msk.f32.vlgmr.msra.gmra.mrb[0].mxu0 %vm79_vm0, %v3150_v7  ;;  %2823 = vmatpush3.bf16.msra.mxu1 %v2820_v24 }
  0x43   :  { %2683 = vmatprep.mubr.msk.f32.mxu0 %vm79_vm0, %v3152_v8  ;;  %2732 = vmatprep.subr.mxu1 %v3063_v57 }
  0x44   :  { %2738 = vmatpush3.msra.mxu0 %v3150_v7 }
  0x45   :  { %2747 = vmatprep.subr.mxu0 %v3063_v57 }
  0x46   :  { %2684 = vmatmul.mubr.msk.f32.gmra.mrb[2].mxu0 %vm79_vm0, %v3158_v9 }
  0x47   :  { %2686 = vmatprep.mubr.msk.f32.mxu0 %vm79_vm0, %v3160_v10 }
  0x4a   :  { %2687 = vmatmul.mubr.msk.f32.gmra.mrb[4].mxu0 %vm79_vm0, %v3166_v11 }
  0x4b   :  { %2689 = vmatprep.mubr.msk.f32.mxu0 %vm79_vm0, %v3168_v12 }
  0x4e   :  { %2690 = vmatmul.mubr.msk.f32.gmra.mrb[6].mxu0 %vm79_vm0, %v66_v13 }
  0x4f   :  { %2692 = vmatprep.mubr.msk.f32.mxu0 %vm79_vm0, %v67_v14 }
  0x52   :  { %2693 = vmatmul.mubr.msk.f32.gmra.mrb[8].mxu0 %vm79_vm0, %v68_v15 }
  0x53   :  { %2695 = vmatprep.mubr.msk.f32.mxu0 %vm79_vm0, %v69_v16 }
  0x56   :  { %2696 = vmatmul.mubr.msk.f32.gmra.mrb[10].mxu0 %vm79_vm0, %v70_v17 }
  0x57   :  { %2698 = vmatprep.mubr.msk.f32.mxu0 %vm79_vm0, %v71_v18 }
  0x5a   :  { %2699 = vmatmul.mubr.msk.f32.gmra.mrb[12].mxu0 %vm79_vm0, %v72_v19 }
  0x5b   :  { %2701 = vmatprep.mubr.msk.f32.mxu0 %vm79_vm0, %v73_v20 }
  0x5e   :  { %2702 = vmatmul.mubr.msk.f32.gmra.mrb[14].mxu0 %vm79_vm0, %v74_v21 }
  0x5f   :  { %2739 = vmatprep.mubr.msk.f32.mxu0 %vm3064_vm3, %v3063_v57 }
 0x115   :  { %v2682_v25 = vpop.f32.mrb[0].mxu0 }
 0x116   :  { %v194_v26 = vpop.f32.mrb[1].mxu0 }
 0x117   :  { %2835 = vtanh.f32 %v194_v26 }
 0x118   :  { %2837 = vtanh.f32 %v2682_v25 }
 0x119   :  { %v2685_v27 = vpop.f32.mrb[2].mxu0 }
 0x11a   :  { %2839 = vtanh.f32 %v2685_v27  ;;  %v204_v28 = vpop.f32.mrb[3].mxu0 }
 0x11b   :  { %2841 = vtanh.f32 %v204_v28 }
 0x11d   :  { %v2688_v29 = vpop.f32.mrb[4].mxu0 }
 0x11e   :  { %2843 = vtanh.f32 %v2688_v29  ;;  %v214_v30 = vpop.f32.mrb[5].mxu0 }
 0x11f   :  { %2845 = vtanh.f32 %v214_v30 }
 0x121   :  { %v2836_v31 = vpop.eup %2835  ;;  %v2691_v32 = vpop.f32.mrb[6].mxu0 }
 0x122   :  { %v2838_v33 = vpop.eup %2837  ;;  %2847 = vtanh.f32 %v2691_v32  ;;  %v224_v34 = vpop.f32.mrb[7].mxu0  ;;  %2708 = vmatprep.mubr.msk.f32.mxu1 %vm291_vm1, %v2836_v31 }
 0x123   :  { %2849 = vtanh.f32 %v224_v34  ;;  %2709 = vmatmul.mubr.msk.f32.vlgmr.msra.gmra.mrb[0].mxu1 %vm291_vm1, %v2838_v33 }
 0x124   :  { %v2840_v35 = vpop.eup %2839  ;;  %2733 = vmatpush3.msra.mxu1 %v3146_v5 }
 0x125   :  { %v2842_v36 = vpop.eup %2841  ;;  %v2694_v37 = vpop.f32.mrb[8].mxu0  ;;  %2742 = vmatprep.subr.mxu1 %v3063_v57 }
 0x126   :  { %2851 = vtanh.f32 %v2694_v37  ;;  %v234_v38 = vpop.f32.mrb[9].mxu0  ;;  %2711 = vmatprep.mubr.msk.f32.mxu1 %vm291_vm1, %v2842_v36 }
 0x127   :  { %2853 = vtanh.f32 %v234_v38  ;;  %2712 = vmatmul.mubr.msk.f32.gmra.mrb[2].mxu1 %vm291_vm1, %v2840_v35 }
 0x128   :  { %v2844_v39 = vpop.eup %2843 }
 0x129   :  { %v2846_v40 = vpop.eup %2845  ;;  %v2697_v41 = vpop.f32.mrb[10].mxu0 }
 0x12a   :  { %2855 = vtanh.f32 %v2697_v41  ;;  %v244_v42 = vpop.f32.mrb[11].mxu0  ;;  %2714 = vmatprep.mubr.msk.f32.mxu1 %vm291_vm1, %v2846_v40 }
 0x12b   :  { %2857 = vtanh.f32 %v244_v42  ;;  %2715 = vmatmul.mubr.msk.f32.gmra.mrb[4].mxu1 %vm291_vm1, %v2844_v39 }
 0x12c   :  { %v2848_v43 = vpop.eup %2847 }
 0x12d   :  { %v2850_v44 = vpop.eup %2849  ;;  %v2700_v45 = vpop.f32.mrb[12].mxu0 }
 0x12e   :  { %2859 = vtanh.f32 %v2700_v45  ;;  %v254_v46 = vpop.f32.mrb[13].mxu0  ;;  %2717 = vmatprep.mubr.msk.f32.mxu1 %vm291_vm1, %v2850_v44 }
 0x12f   :  { %2861 = vtanh.f32 %v254_v46  ;;  %2718 = vmatmul.mubr.msk.f32.gmra.mrb[6].mxu1 %vm291_vm1, %v2848_v43 }
 0x130   :  { %v2852_v47 = vpop.eup %2851 }
 0x131   :  { %v2854_v48 = vpop.eup %2853  ;;  %v2703_v49 = vpop.f32.mrb[14].mxu0 }
 0x132   :  { %2863 = vtanh.f32 %v2703_v49  ;;  %v264_v50 = vpop.f32.mrb[15].mxu0  ;;  %2720 = vmatprep.mubr.msk.f32.mxu1 %vm291_vm1, %v2854_v48 }
 0x133   :  { %2865 = vtanh.f32 %v264_v50  ;;  %2721 = vmatmul.mubr.msk.f32.gmra.mrb[8].mxu1 %vm291_vm1, %v2852_v47 }
 0x134   :  { %v2856_v51 = vpop.eup %2855 }
 0x135   :  { %v2858_v52 = vpop.eup %2857 }
 0x136   :  { %2723 = vmatprep.mubr.msk.f32.mxu1 %vm291_vm1, %v2858_v52 }
 0x137   :  { %2724 = vmatmul.mubr.msk.f32.gmra.mrb[10].mxu1 %vm291_vm1, %v2856_v51 }
 0x138   :  { %v2860_v53 = vpop.eup %2859 }
 0x139   :  { %v2862_v54 = vpop.eup %2861 }
 0x13a   :  { %2726 = vmatprep.mubr.msk.f32.mxu1 %vm291_vm1, %v2862_v54 }
 0x13b   :  { %2727 = vmatmul.mubr.msk.f32.gmra.mrb[12].mxu1 %vm291_vm1, %v2860_v53 }
 0x13c   :  { %v2864_v55 = vpop.eup %2863 }
 0x13d   :  { %v2866_v56 = vpop.eup %2865 }
 0x13e   :  { %2729 = vmatprep.mubr.msk.f32.mxu1 %vm291_vm1, %v2866_v56 }
 0x13f   :  { %2730 = vmatmul.mubr.msk.f32.gmra.mrb[14].mxu1 %vm291_vm1, %v2864_v55 }
 0x140   :  { %2734 = vmatprep.mubr.msk.f32.mxu1 %vm3064_vm3, %v3063_v57 }
 0x1f6   :  { %v2710_v58 = vpop.f32.mrb[0].mxu1 }
 0x1f7   :  { %v493_v59 = vsel %vm485_vm2, %v2710_v58, -inf  ;;  %v406_v60 = vpop.f32.mrb[1].mxu1 }
 0x1f8   :  { %v494_v61 = vrot.slane %v493_v59, 4  ;;  %v486_v62 = vsel %vm485_vm2, %v406_v60, -inf }
 0x1f9   :  { %v487_v63 = vrot.slane %v486_v62, 4 }
 0x1fa   :  { %v495_v0 = vmax.f32 %v493_v59, %v494_v61  ;;  %v2713_v1 = vpop.f32.mrb[2].mxu1 }
 0x1fb   :  { %v488_v2 = vmax.f32 %v486_v62, %v487_v63  ;;  %v507_v3 = vsel %vm485_vm2, %v2713_v1, -inf  ;;  %v416_v4 = vpop.f32.mrb[3].mxu1 }
 0x1fc   :  { %v496_v5 = vrot.slane %v495_v0, 2  ;;  %v508_v6 = vrot.slane %v507_v3, 4  ;;  %v500_v7 = vsel %vm485_vm2, %v416_v4, -inf }
 0x1fd   :  { %v489_v13 = vrot.slane %v488_v2, 2  ;;  %v501_v14 = vrot.slane %v500_v7, 4 }
 0x1fe   :  { %v497_v15 = vmax.f32 %v495_v0, %v496_v5  ;;  %v509_v16 = vmax.f32 %v507_v3, %v508_v6  ;;  %v3209_v17 = vpop.f32.mrb[4].mxu1 }
 0x1ff   :  { %v490_v18 = vmax.f32 %v488_v2, %v489_v13  ;;  %v502_v19 = vmax.f32 %v500_v7, %v501_v14  ;;  %v521_v20 = vsel %vm485_vm2, %v3209_v17, -inf  ;;  %v3213_v21 = vpop.f32.mrb[5].mxu1 }
 0x200   :  { %v498_v22 = vrot.slane %v497_v15, 1  ;;  %v510_v23 = vrot.slane %v509_v16, 2  ;;  %v522_v24 = vrot.slane %v521_v20, 4  ;;  %v514_v25 = vsel %vm485_vm2, %v3213_v21, -inf }
 0x201   :  { %v491_v26 = vrot.slane %v490_v18, 1  ;;  %v503_v27 = vrot.slane %v502_v19, 2  ;;  %v515_v28 = vrot.slane %v514_v25, 4 }
 0x202   :  { %v499_v29 = vmax.f32 %v497_v15, %v498_v22  ;;  %v511_v30 = vmax.f32 %v509_v16, %v510_v23  ;;  %v523_v31 = vmax.f32 %v521_v20, %v522_v24  ;;  %v3217_v32 = vpop.f32.mrb[6].mxu1 }
 0x203   :  { %v492_v33 = vmax.f32 %v490_v18, %v491_v26  ;;  %v504_v34 = vmax.f32 %v502_v19, %v503_v27  ;;  %v516_v35 = vmax.f32 %v514_v25, %v515_v28  ;;  %v535_v36 = vsel %vm485_vm2, %v3217_v32, -inf  ;;  %v3221_v37 = vpop.f32.mrb[7].mxu1 }
 0x204   :  { %v599_v38 = vsub.f32 %v2710_v58, %v499_v29  ;;  %v512_v39 = vrot.slane %v511_v30, 1  ;;  %v524_v40 = vrot.slane %v523_v31, 2  ;;  %v536_v41 = vrot.slane %v535_v36, 4 }
 0x205   :  { %v598_v42 = vsub.f32 %v406_v60, %v492_v33  ;;  %v505_v43 = vrot.slane %v504_v34, 1  ;;  %v517_v44 = vrot.slane %v516_v35, 2  ;;  %v528_v45 = vsel %vm485_vm2, %v3221_v37, -inf }
 0x206   :  { %v616_v46 = vmul.f32 1.442695, %v599_v38  ;;  %v513_v47 = vmax.f32 %v511_v30, %v512_v39  ;;  %v525_v48 = vmax.f32 %v523_v31, %v524_v40  ;;  %v537_v49 = vmax.f32 %v535_v36, %v536_v41  ;;  %v3225_v50 = vpop.f32.mrb[8].mxu1 }
 0x207   :  { %v614_v51 = vmul.f32 1.442695, %v598_v42  ;;  %v506_v52 = vmax.f32 %v504_v34, %v505_v43  ;;  %v518_v53 = vmax.f32 %v516_v35, %v517_v44  ;;  %v529_v54 = vrot.slane %v528_v45, 4  ;;  %v3227_v55 = vpop.f32.mrb[9].mxu1 }
 0x208   :  { %2867 = vpow2.f32 %v616_v46  ;;  %v601_v56 = vsub.f32 %v2713_v1, %v513_v47  ;;  %v526_v58 = vrot.slane %v525_v48, 1  ;;  %v538_v59 = vrot.slane %v537_v49, 2 }
 0x209   :  { %2869 = vpow2.f32 %v614_v51  ;;  %v600_v60 = vsub.f32 %v416_v4, %v506_v52  ;;  %v519_v61 = vrot.slane %v518_v53, 1  ;;  %v530_v62 = vmax.f32 %v528_v45, %v529_v54 }
 0x20a   :  { %v620_v63 = vmul.f32 1.442695, %v601_v56  ;;  %v527_v0 = vmax.f32 %v525_v48, %v526_v58  ;;  %v539_v2 = vmax.f32 %v537_v49, %v538_v59  ;;  %v549_v3 = vsel %vm485_vm2, %v3225_v50, -inf  ;;  %v3231_v5 = vpop.f32.mrb[10].mxu1 }
 0x20b   :  { %v618_v6 = vmul.f32 1.442695, %v600_v60  ;;  %v520_v7 = vmax.f32 %v518_v53, %v519_v61  ;;  %v531_v13 = vrot.slane %v530_v62, 2  ;;  %v550_v14 = vrot.slane %v549_v3, 4  ;;  %v3233_v15 = vpop.f32.mrb[11].mxu1 }
 0x20c   :  { %2871 = vpow2.f32 %v620_v63  ;;  %v603_v1 = vsub.f32 %v3209_v17, %v527_v0  ;;  %v540_v4 = vrot.slane %v539_v2, 1  ;;  %v542_v16 = vsel %vm485_vm2, %v3227_v55, -inf }
 0x20d   :  { %2873 = vpow2.f32 %v618_v6  ;;  %v602_v18 = vsub.f32 %v3213_v21, %v520_v7  ;;  %v532_v19 = vmax.f32 %v530_v62, %v531_v13  ;;  %v551_v20 = vmax.f32 %v549_v3, %v550_v14 }
 0x20e   :  { %v624_v22 = vmul.f32 1.442695, %v603_v1  ;;  %v541_v23 = vmax.f32 %v539_v2, %v540_v4  ;;  %v543_v24 = vrot.slane %v542_v16, 4  ;;  %v563_v25 = vsel %vm485_vm2, %v3231_v5, -inf  ;;  %v3241_v26 = vpop.f32.mrb[12].mxu1 }
 0x20f   :  { %v622_v27 = vmul.f32 1.442695, %v602_v18  ;;  %v533_v28 = vrot.slane %v532_v19, 1  ;;  %v552_v17 = vrot.slane %v551_v20, 2  ;;  %v564_v29 = vrot.slane %v563_v25, 4  ;;  %v3243_v30 = vpop.f32.mrb[13].mxu1 }
 0x210   :  { %2875 = vpow2.f32 %v624_v22  ;;  %v605_v31 = vsub.f32 %v3217_v32, %v541_v23  ;;  %v544_v21 = vmax.f32 %v542_v16, %v543_v24  ;;  %v556_v33 = vsel %vm485_vm2, %v3233_v15, -inf }
 0x211   :  { %2877 = vpow2.f32 %v622_v27  ;;  %v534_v34 = vmax.f32 %v532_v19, %v533_v28  ;;  %v553_v35 = vmax.f32 %v551_v20, %v552_v17  ;;  %v565_v36 = vmax.f32 %v563_v25, %v564_v29 }
 0x212   :  { %v3248_v38 = vpop.eup %2867  ;;  %v628_v39 = vmul.f32 1.442695, %v605_v31  ;;  %v545_v40 = vrot.slane %v544_v21, 2  ;;  %v557_v41 = vrot.slane %v556_v33, 4  ;;  %v577_v42 = vsel %vm485_vm2, %v3241_v26, -inf  ;;  %v3252_v43 = vpop.f32.mrb[14].mxu1 }
 0x213   :  { %v3254_v44 = vpop.eup %2869  ;;  %v653_v32 = vsel %vm485_vm2, %v3248_v38, 0.0  ;;  %v604_v45 = vsub.f32 %v3221_v37, %v534_v34  ;;  %v554_v46 = vrot.slane %v553_v35, 1  ;;  %v566_v47 = vrot.slane %v565_v36, 2  ;;  %v3259_v48 = vpop.f32.mrb[15].mxu1 }
 0x214   :  { %v654_v49 = vrot.slane %v653_v32, 4  ;;  %v646_v51 = vsel %vm485_vm2, %v3254_v44, 0.0  ;;  %2879 = vpow2.f32 %v628_v39  ;;  %v546_v52 = vmax.f32 %v544_v21, %v545_v40 }
 0x215   :  { %v647_v53 = vrot.slane %v646_v51, 4  ;;  %v626_v54 = vmul.f32 1.442695, %v604_v45  ;;  %v555_v56 = vmax.f32 %v553_v35, %v554_v46  ;;  %v567_v58 = vmax.f32 %v565_v36, %v566_v47 }
 0x216   :  { %v3263_v59 = vpop.eup %2871  ;;  %v3265_v60 = vadd.f32 %v654_v49, %v653_v32  ;;  %v547_v61 = vrot.slane %v546_v52, 1  ;;  %v558_v37 = vmax.f32 %v556_v33, %v557_v41  ;;  %v578_v62 = vrot.slane %v577_v42, 4 }
 0x217   :  { %v3267_v63 = vpop.eup %2873  ;;  %v3269_v0 = vadd.f32 %v647_v53, %v646_v51  ;;  %v667_v2 = vsel %vm485_vm2, %v3263_v59, 0.0  ;;  %2881 = vpow2.f32 %v626_v54  ;;  %v607_v3 = vsub.f32 %v3225_v50, %v555_v56 }
 0x218   :  { %v656_v6 = vrot.slane %v3265_v60, 2  ;;  %v668_v7 = vrot.slane %v667_v2, 4  ;;  %v660_v13 = vsel %vm485_vm2, %v3267_v63, 0.0  ;;  %v548_v14 = vmax.f32 %v546_v52, %v547_v61 }
 0x219   :  { %v649_v1 = vrot.slane %v3269_v0, 2  ;;  %v661_v4 = vrot.slane %v660_v13, 4  ;;  %v632_v16 = vmul.f32 1.442695, %v607_v3  ;;  %v568_v18 = vrot.slane %v567_v58, 1 }
 0x21a   :  { %v3278_v19 = vpop.eup %2875  ;;  %v3280_v20 = vadd.f32 %v668_v7, %v667_v2  ;;  %v606_v22 = vsub.f32 %v3227_v55, %v548_v14  ;;  %v559_v23 = vrot.slane %v558_v37, 2  ;;  %v579_v50 = vmax.f32 %v577_v42, %v578_v62 }
 0x21b   :  { %v3283_v24 = vpop.eup %2877  ;;  %v3285_v25 = vadd.f32 %v661_v4, %v660_v13  ;;  %v681_v27 = vsel %vm485_vm2, %v3278_v19, 0.0  ;;  %2883 = vpow2.f32 %v632_v16  ;;  %v569_v28 = vmax.f32 %v567_v58, %v568_v18 }
 0x21c   :  { %v670_v17 = vrot.slane %v3280_v20, 2  ;;  %v682_v29 = vrot.slane %v681_v27, 4  ;;  %v674_v31 = vsel %vm485_vm2, %v3283_v24, 0.0  ;;  %v630_v21 = vmul.f32 1.442695, %v606_v22 }
 0x21d   :  { %v663_v55 = vrot.slane %v3285_v25, 2  ;;  %v675_v33 = vrot.slane %v674_v31, 4  ;;  %v609_v34 = vsub.f32 %v3231_v5, %v569_v28  ;;  %v560_v35 = vmax.f32 %v558_v37, %v559_v23 }
 0x21e   :  { %v3294_v36 = vpop.eup %2879  ;;  %v3296_v39 = vadd.f32 %v682_v29, %v681_v27  ;;  %2885 = vpow2.f32 %v630_v21  ;;  %v580_v40 = vrot.slane %v579_v50, 2  ;;  %v570_v41 = vsel %vm485_vm2, %v3243_v30, -inf }
 0x21f   :  { %v3300_v42 = vadd.f32 %v675_v33, %v674_v31  ;;  %v695_v32 = vsel %vm485_vm2, %v3294_v36, 0.0  ;;  %v636_v45 = vmul.f32 1.442695, %v609_v34  ;;  %v561_v46 = vrot.slane %v560_v35, 1 }
 0x220   :  { %v684_v47 = vrot.slane %v3296_v39, 2  ;;  %v696_v5 = vrot.slane %v695_v32, 4  ;;  %v581_v49 = vmax.f32 %v579_v50, %v580_v40  ;;  %v571_v51 = vrot.slane %v570_v41, 4 }
 0x221   :  { %v3305_v52 = vpop.eup %2881  ;;  %v677_v53 = vrot.slane %v3300_v42, 2  ;;  %2887 = vpow2.f32 %v636_v45  ;;  %v562_v54 = vmax.f32 %v560_v35, %v561_v46  ;;  %v591_v56 = vsel %vm485_vm2, %v3252_v43, -inf }
 0x222   :  { %v3310_v58 = vadd.f32 %v696_v5, %v695_v32  ;;  %v688_v61 = vsel %vm485_vm2, %v3305_v52, 0.0  ;;  %v582_v37 = vrot.slane %v581_v49, 1  ;;  %v572_v62 = vmax.f32 %v570_v41, %v571_v51 }
 0x223   :  { %v689_v2 = vrot.slane %v688_v61, 4  ;;  %v608_v3 = vsub.f32 %v3233_v15, %v562_v54  ;;  %v592_v7 = vrot.slane %v591_v56, 4  ;;  %v584_v13 = vsel %vm485_vm2, %v3259_v48, -inf }
 0x224   :  { %v698_v14 = vrot.slane %v3310_v58, 2  ;;  %v583_v4 = vmax.f32 %v581_v49, %v582_v37  ;;  %v573_v16 = vrot.slane %v572_v62, 2  ;;  %v585_v18 = vrot.slane %v584_v13, 4 }
 0x225   :  { %v3318_v22 = vpop.eup %2883  ;;  %v3320_v23 = vadd.f32 %v689_v2, %v688_v61  ;;  %v634_v50 = vmul.f32 1.442695, %v608_v3  ;;  %v593_v27 = vmax.f32 %v591_v56, %v592_v7  ;;  %v650_v28 = vadd.f32 %v649_v1, %v3269_v0 }
 0x226   :  { %v709_v15 = vsel %vm485_vm2, %v3318_v22, 0.0  ;;  %v611_v29 = vsub.f32 %v3241_v26, %v583_v4  ;;  %v574_v31 = vmax.f32 %v572_v62, %v573_v16  ;;  %v586_v21 = vmax.f32 %v584_v13, %v585_v18 }
 0x227   :  { %v691_v33 = vrot.slane %v3320_v23, 2  ;;  %v710_v34 = vrot.slane %v709_v15, 4  ;;  %2889 = vpow2.f32 %v634_v50  ;;  %v594_v35 = vrot.slane %v593_v27, 2 }
 0x228   :  { %v3327_v40 = vpop.eup %2885  ;;  %v640_v41 = vmul.f32 1.442695, %v611_v29  ;;  %v575_v32 = vrot.slane %v574_v31, 1  ;;  %v587_v45 = vrot.slane %v586_v21, 2  ;;  %v651_v46 = vrot.slane %v650_v28, 1 }
 0x229   :  { %v3329_v5 = vadd.f32 %v710_v34, %v709_v15  ;;  %v702_v0 = vsel %vm485_vm2, %v3327_v40, 0.0  ;;  %v595_v1 = vmax.f32 %v593_v27, %v594_v35  ;;  %v671_v26 = vadd.f32 %v670_v17, %v3280_v20 }
 0x22a   :  { %v703_v49 = vrot.slane %v702_v0, 4  ;;  %2891 = vpow2.f32 %v640_v41  ;;  %v576_v51 = vmax.f32 %v574_v31, %v575_v32  ;;  %v588_v54 = vmax.f32 %v586_v21, %v587_v45 }
 0x22b   :  { %v3334_v56 = vpop.eup %2887  ;;  %v712_v61 = vrot.slane %v3329_v5, 2  ;;  %v596_v37 = vrot.slane %v595_v1, 1  ;;  %v652_v62 = vadd.f32 %v651_v46, %v650_v28  ;;  %v672_v2 = vrot.slane %v671_v26, 1 }
 0x22c   :  { %v704_v3 = vadd.f32 %v703_v49, %v702_v0  ;;  %v723_v7 = vsel %vm485_vm2, %v3334_v56, 0.0  ;;  %v610_v13 = vsub.f32 %v3243_v30, %v576_v51  ;;  %v589_v4 = vrot.slane %v588_v54, 1 }
 0x22d   :  { %v724_v16 = vrot.slane %v723_v7, 4  ;;  %v597_v20 = vmax.f32 %v595_v1, %v596_v37  ;;  %2893 = vrcp.f32 %v652_v62  ;;  %v673_v17 = vadd.f32 %v672_v2, %v671_v26 }
 0x22e   :  { %v705_v18 = vrot.slane %v704_v3, 2  ;;  %v638_v50 = vmul.f32 1.442695, %v610_v13  ;;  %v590_v27 = vmax.f32 %v588_v54, %v589_v4  ;;  %v657_v15 = vadd.f32 %v656_v6, %v3265_v60 }
 0x22f   :  { %v725_v28 = vadd.f32 %v724_v16, %v723_v7  ;;  %v613_v29 = vsub.f32 %v3252_v43, %v597_v20  ;;  %2895 = vrcp.f32 %v673_v17  ;;  %v664_v30 = vadd.f32 %v663_v55, %v3285_v25 }
 0x230   :  { %2897 = vpow2.f32 %v638_v50  ;;  %v612_v31 = vsub.f32 %v3259_v48, %v590_v27  ;;  %v658_v21 = vrot.slane %v657_v15, 1  ;;  %v678_v34 = vadd.f32 %v677_v53, %v3300_v42 }
 0x231   :  { %v3351_v35 = vpop.eup %2889  ;;  %v726_v41 = vrot.slane %v725_v28, 2  ;;  %v644_v60 = vmul.f32 1.442695, %v613_v29  ;;  %v665_v6 = vrot.slane %v664_v30, 1  ;;  %v685_v43 = vadd.f32 %v684_v47, %v3296_v39 }
 0x232   :  { %v716_v25 = vsel %vm485_vm2, %v3351_v35, 0.0  ;;  %v642_v55 = vmul.f32 1.442695, %v612_v31  ;;  %v659_v32 = vadd.f32 %v658_v21, %v657_v15  ;;  %v679_v48 = vrot.slane %v678_v34, 1 }
 0x233   :  { %v717_v45 = vrot.slane %v716_v25, 4  ;;  %2899 = vpow2.f32 %v644_v60  ;;  %v666_v46 = vadd.f32 %v665_v6, %v664_v30  ;;  %v686_v0 = vrot.slane %v685_v43, 1 }
 0x234   :  { %v3358_v42 = vpop.eup %2891  ;;  %2901 = vpow2.f32 %v642_v55  ;;  %v680_v53 = vadd.f32 %v679_v48, %v678_v34  ;;  %v692_v1 = vadd.f32 %v691_v33, %v3320_v23  ;;  %v699_v39 = vadd.f32 %v698_v14, %v3310_v58 }
 0x235   :  { %v718_v47 = vadd.f32 %v717_v45, %v716_v25  ;;  %v737_v26 = vsel %vm485_vm2, %v3358_v42, 0.0  ;;  %2903 = vrcp.f32 %v659_v32  ;;  %v687_v49 = vadd.f32 %v686_v0, %v685_v43 }
 0x236   :  { %v738_v51 = vrot.slane %v737_v26, 4  ;;  %2905 = vrcp.f32 %v666_v46  ;;  %v693_v54 = vrot.slane %v692_v1, 1  ;;  %v700_v37 = vrot.slane %v699_v39, 1 }
 0x237   :  { %v2894_v62 = vpop.eup %2893  ;;  %v719_v2 = vrot.slane %v718_v47, 2  ;;  %2907 = vrcp.f32 %v680_v53  ;;  %v706_v7 = vadd.f32 %v705_v18, %v704_v3  ;;  %v713_v23 = vadd.f32 %v712_v61, %v3329_v5 }
 0x238   :  { %v739_v33 = vadd.f32 %v738_v51, %v737_v26  ;;  %v774_v13 = vmul.f32 %v2894_v62, %v3254_v44  ;;  %2909 = vrcp.f32 %v687_v49  ;;  %v694_v58 = vadd.f32 %v693_v54, %v692_v1 }
 0x239   :  { %v2896_v14 = vpop.eup %2895  ;;  %v701_v4 = vadd.f32 %v700_v37, %v699_v39  ;;  %v707_v16 = vrot.slane %v706_v7, 1  ;;  %v714_v20 = vrot.slane %v713_v23, 1  ;;  %v720_v17 = vadd.f32 %v719_v2, %v718_v47 }
 0x23a   :  { %v3368_v50 = vpop.eup %2897  ;;  %v740_v27 = vrot.slane %v739_v33, 2  ;;  %822 = vxpose.xlu0.b32.start.end [1/1] (short) (narrow) %v774_v13, 8  ;;  %790 = vst.msk [vmem:[#allocation9] sm:$0xff] %vm485_vm2, %v774_v13  ;;  %v777_v3 = vmul.f32 %v2896_v14, %v3263_v59  ;;  %2911 = vrcp.f32 %v694_v58  ;;  %v727_v5 = vadd.f32 %v726_v41, %v725_v28 }
 0x23b   :  { %v730_v44 = vsel %vm485_vm2, %v3368_v50, 0.0  ;;  %2913 = vrcp.f32 %v701_v4  ;;  %v708_v61 = vadd.f32 %v707_v16, %v706_v7  ;;  %v715_v18 = vadd.f32 %v714_v20, %v713_v23 }
 0x23c   :  { %v731_v15 = vrot.slane %v730_v44, 4  ;;  %1138 = vxpose.xlu1.b32.start.end [1/1] (short) (narrow) %v777_v3, 8  ;;  %793 = vst.msk [vmem:[#allocation9 + $0x18] sm:$0xff] %vm485_vm2, %v777_v3  ;;  %v721_v29 = vrot.slane %v720_v17, 1  ;;  %v728_v30 = vrot.slane %v727_v5, 1  ;;  %v741_v31 = vadd.f32 %v740_v27, %v739_v33 }
 0x23d   :  { %v3375_v21 = vpop.eup %2899  ;;  %2915 = vrcp.f32 %v708_v61 }
 0x23e   :  { %v3377_v34 = vpop.eup %2901  ;;  %v732_v59 = vadd.f32 %v731_v15, %v730_v44  ;;  %v751_v28 = vsel %vm485_vm2, %v3375_v21, 0.0  ;;  %2917 = vrcp.f32 %v715_v18  ;;  %v722_v41 = vadd.f32 %v721_v29, %v720_v17 }
 0x23f   :  { %v2904_v60 = vpop.eup %2903  ;;  %v752_v6 = vrot.slane %v751_v28, 4  ;;  %v744_v43 = vsel %vm485_vm2, %v3377_v34, 0.0  ;;  %v729_v25 = vadd.f32 %v728_v30, %v727_v5  ;;  %v742_v55 = vrot.slane %v741_v31, 1 }
 0x240   :  { %v2906_v32 = vpop.eup %2905  ;;  %v733_v48 = vrot.slane %v732_v59, 2  ;;  %v745_v45 = vrot.slane %v744_v43, 4  ;;  %v775_v46 = vmul.f32 %v2904_v60, %v3248_v38  ;;  %2919 = vrcp.f32 %v722_v41 }
 0x241   :  { %v2908_v0 = vpop.eup %2907  ;;  %v753_v53 = vadd.f32 %v752_v6, %v751_v28  ;;  %v776_v1 = vmul.f32 %v2906_v32, %v3267_v63  ;;  %2921 = vrcp.f32 %v729_v25  ;;  %v743_v39 = vadd.f32 %v742_v55, %v741_v31  ;;  %v2934_v28 = vld [vmem:[#allocation2 + $0x50] sm:$0xff]  ;;  %v2935_v6 = vld [vmem:[#allocation2 + $0x58] sm:$0xff]  ;;  %v2937_v32 = vld [vmem:[#allocation2 + $0x68] sm:$0xff] }
 0x242   :  { %v2910_v47 = vpop.eup %2909  ;;  %v746_v26 = vadd.f32 %v745_v45, %v744_v43  ;;  %791 = vst.msk [vmem:[#allocation9 + $0x8] sm:$0xff] %vm485_vm2, %v775_v46  ;;  %928 = vxpose.xlu0.b32.start.end [1/1] (short) (narrow) %v775_v46, 8  ;;  %v778_v49 = vmul.f32 %v2908_v0, %v3283_v24  ;;  %v734_v51 = vadd.f32 %v733_v48, %v732_v59  ;;  %v2933_v59 = vld [vmem:[#allocation2 + $0x48] sm:$0xff]  ;;  %v2936_v43 = vld [vmem:[#allocation2 + $0x60] sm:$0xff]  ;;  %v2938_v48 = vld [vmem:[#allocation2 + $0x70] sm:$0xff] }
 0x243   :  { %v754_v54 = vrot.slane %v753_v53, 2  ;;  %1033 = vxpose.xlu1.b32.start.end [1/1] (short) (narrow) %v776_v1, 8  ;;  %792 = vst.msk [vmem:[#allocation9 + $0x10] sm:$0xff] %vm485_vm2, %v776_v1  ;;  %v779_v38 = vmul.f32 %v2910_v47, %v3278_v19  ;;  %2923 = vrcp.f32 %v743_v39  ;;  %v2939_v46 = vld [vmem:[#allocation2 + $0x78] sm:$0xff] }
 0x244   :  { %v2912_v37 = vpop.eup %2911  ;;  %v747_v62 = vrot.slane %v746_v26, 2  ;;  %794 = vst.msk [vmem:[#allocation9 + $0x20] sm:$0xff] %vm485_vm2, %v778_v49  ;;  %v735_v63 = vrot.slane %v734_v51, 1 }
 0x245   :  { %v2914_v2 = vpop.eup %2913  ;;  %795 = vst.msk [vmem:[#allocation9 + $0x28] sm:$0xff] %vm485_vm2, %v779_v38  ;;  %v780_v7 = vmul.f32 %v2912_v37, %v3305_v52  ;;  %v755_v23 = vadd.f32 %v754_v54, %v753_v53 }
 0x246   :  { %1243 = vxpose.xlu0.b32.start.end [1/1] (short) (narrow) %v778_v49, 8  ;;  %v781_v24 = vmul.f32 %v2914_v2, %v3294_v36  ;;  %v736_v33 = vadd.f32 %v735_v63, %v734_v51  ;;  %v748_v13 = vadd.f32 %v747_v62, %v746_v26 }
 0x247   :  { %v2916_v58 = vpop.eup %2915  ;;  %1348 = vxpose.xlu1.b32.start.end [1/1] (short) (narrow) %v779_v38, 8  ;;  %796 = vst.msk [vmem:[#allocation9 + $0x30] sm:$0xff] %vm485_vm2, %v780_v7  ;;  %v756_v19 = vrot.slane %v755_v23, 1 }
 0x248   :  { %v2918_v14 = vpop.eup %2917  ;;  %797 = vst.msk [vmem:[#allocation9 + $0x38] sm:$0xff] %vm485_vm2, %v781_v24  ;;  %v782_v4 = vmul.f32 %v2916_v58, %v3327_v40  ;;  %2925 = vrcp.f32 %v736_v33  ;;  %v749_v16 = vrot.slane %v748_v13, 1 }
 0x249   :  { %v783_v52 = vmul.f32 %v2918_v14, %v3318_v22  ;;  %v757_v20 = vadd.f32 %v756_v19, %v755_v23 }
 0x24a   :  { %v2920_v17 = vpop.eup %2919  ;;  %1453 = vxpose.xlu0.b32.start.end [1/1] (short) (narrow) %v780_v7, 8  ;;  %798 = vst.msk [vmem:[#allocation9 + $0x40] sm:$0xff] %vm485_vm2, %v782_v4  ;;  %v750_v36 = vadd.f32 %v749_v16, %v748_v13 }
 0x24b   :  { %v2922_v27 = vpop.eup %2921  ;;  %1558 = vxpose.xlu1.b32.start.end [1/1] (short) (narrow) %v781_v24, 8  ;;  %799 = vst.msk [vmem:[#allocation9 + $0x48] sm:$0xff] %vm485_vm2, %v783_v52  ;;  %v784_v3 = vmul.f32 %v2920_v17, %v3351_v35  ;;  %2927 = vrcp.f32 %v757_v20 }
 0x24c   :  { %v785_v5 = vmul.f32 %v2922_v27, %v3334_v56  ;;  %2929 = vrcp.f32 %v750_v36 }
 0x24d   :  { %v2924_v40 = vpop.eup %2923  ;;  %800 = vst.msk [vmem:[#allocation9 + $0x50] sm:$0xff] %vm485_vm2, %v784_v3 }
 0x24e   :  { %1663 = vxpose.xlu0.b32.start.end [1/1] (short) (narrow) %v782_v4, 8  ;;  %801 = vst.msk [vmem:[#allocation9 + $0x58] sm:$0xff] %vm485_vm2, %v785_v5  ;;  %v787_v22 = vmul.f32 %v2924_v40, %v3358_v42 }
 0x24f   :  { %1768 = vxpose.xlu1.b32.start.end [1/1] (short) (narrow) %v783_v52, 8 }
 0x250   :  { %803 = vst.msk [vmem:[#allocation9 + $0x68] sm:$0xff] %vm485_vm2, %v787_v22 }
 0x252   :  { %v2926_v44 = vpop.eup %2925  ;;  %1873 = vxpose.xlu0.b32.start.end [1/1] (short) (narrow) %v784_v3, 8 }
 0x253   :  { %1978 = vxpose.xlu1.b32.start.end [1/1] (short) (narrow) %v785_v5, 8  ;;  %v786_v35 = vmul.f32 %v2926_v44, %v3368_v50 }
 0x255   :  { %v2928_v61 = vpop.eup %2927  ;;  %802 = vst.msk [vmem:[#allocation9 + $0x60] sm:$0xff] %vm485_vm2, %v786_v35 }
 0x256   :  { %v2930_v56 = vpop.eup %2929  ;;  %2083 = vxpose.xlu0.b32.start.end [1/1] (short) (narrow) %v786_v35, 8  ;;  %v789_v18 = vmul.f32 %v2928_v61, %v3375_v21  ;;  %v2931_v21 = vld [vmem:[#allocation2 + $0x38] sm:$0xff] }
 0x257   :  { %2188 = vxpose.xlu1.b32.start.end [1/1] (short) (narrow) %v787_v22, 8  ;;  %v788_v15 = vmul.f32 %v2930_v56, %v3377_v34 }
 0x258   :  { %805 = vst.msk [vmem:[#allocation9 + $0x78] sm:$0xff] %vm485_vm2, %v789_v18 }
 0x259   :  { %804 = vst.msk [vmem:[#allocation9 + $0x70] sm:$0xff] %vm485_vm2, %v788_v15 }
 0x25a   :  { %2293 = vxpose.xlu0.b32.start.end [1/1] (short) (narrow) %v788_v15, 8 }
 0x25b   :  { %2398 = vxpose.xlu1.b32.start.end [1/1] (short) (narrow) %v789_v18, 8 }
 0x2ba   :  { %v838_v42 = vpop.trf.xlu0 }
 0x2bb   :  { %2735 = vmatmul.mubr.msk.f32.vlgmr.msra.gmra.mrb[16].mxu1 %vm854_vm4, %v838_v42 }
 0x2bc   :  { %2743 = vmatpush3.msra.mxu1 %v3152_v8  ;;  %2744 = vmatprep.mubr.msk.f32.mxu1 %vm3064_vm3, %v3063_v57  ;;  %v1154_v50 = vpop.trf.xlu1 }
 0x2bd   :  { %2752 = vmatprep.subr.mxu1 %v3063_v57 }
 0x2c2   :  { %v944_v29 = vpop.trf.xlu0 }
 0x2c3   :  { %2740 = vmatmul.mubr.msk.f32.vlgmr.msra.gmra.mrb[16].mxu0 %vm854_vm4, %v944_v29  ;;  %v1049_v30 = vpop.trf.xlu1 }
 0x2c4   :  { %2748 = vmatpush3.msra.mxu0 %v3158_v9  ;;  %2745 = vmatmul.mubr.msk.f32.vlgmr.msra.gmra.mrb[18].mxu1 %vm854_vm4, %v1049_v30 }
 0x2c5   :  { %2749 = vmatprep.mubr.msk.f32.mxu0 %vm3064_vm3, %v3063_v57  ;;  %2757 = vmatprep.subr.mxu0 %v3063_v57 }
 0x2c6   :  { %2753 = vmatpush3.msra.mxu1 %v3160_v10  ;;  %v1259_v8 = vpop.trf.xlu0  ;;  %2754 = vmatprep.mubr.msk.f32.mxu1 %vm3064_vm3, %v3063_v57 }
 0x2c7   :  { %2750 = vmatmul.mubr.msk.f32.vlgmr.msra.gmra.mrb[18].mxu0 %vm854_vm4, %v1154_v50  ;;  %v1364_v31 = vpop.trf.xlu1  ;;  %2762 = vmatprep.subr.mxu1 %v3063_v57 }
 0x2c8   :  { %2758 = vmatpush3.msra.mxu0 %v3166_v11  ;;  %2759 = vmatprep.mubr.msk.f32.mxu0 %vm3064_vm3, %v3063_v57  ;;  %v2932_v11 = vld [vmem:[#allocation2 + $0x40] sm:$0xff] }
 0x2c9   :  { %2767 = vmatprep.subr.mxu0 %v3063_v57  ;;  %2755 = vmatmul.mubr.msk.f32.vlgmr.msra.gmra.mrb[20].mxu1 %vm854_vm4, %v1259_v8 }
 0x2ca   :  { %2763 = vmatpush3.msra.mxu1 %v3168_v12  ;;  %v1469_v9 = vpop.trf.xlu0  ;;  %2764 = vmatprep.mubr.msk.f32.mxu1 %vm3064_vm3, %v3063_v57 }
 0x2cb   :  { %2760 = vmatmul.mubr.msk.f32.vlgmr.msra.gmra.mrb[20].mxu0 %vm854_vm4, %v1364_v31  ;;  %v1574_v10 = vpop.trf.xlu1  ;;  %2772 = vmatprep.subr.mxu1 %v3063_v57 }
 0x2cc   :  { %2768 = vmatpush3.msra.mxu0 %v2931_v21  ;;  %2769 = vmatprep.mubr.msk.f32.mxu0 %vm3064_vm3, %v3063_v57 }
 0x2cd   :  { %2777 = vmatprep.subr.mxu0 %v3063_v57  ;;  %2765 = vmatmul.mubr.msk.f32.vlgmr.msra.gmra.mrb[22].mxu1 %vm854_vm4, %v1469_v9 }
 0x2ce   :  { %2773 = vmatpush3.msra.mxu1 %v2932_v11  ;;  %v1679_v12 = vpop.trf.xlu0  ;;  %2774 = vmatprep.mubr.msk.f32.mxu1 %vm3064_vm3, %v3063_v57 }
 0x2cf   :  { %2770 = vmatmul.mubr.msk.f32.vlgmr.msra.gmra.mrb[22].mxu0 %vm854_vm4, %v1574_v10  ;;  %v1784_v34 = vpop.trf.xlu1  ;;  %2782 = vmatprep.subr.mxu1 %v3063_v57 }
 0x2d0   :  { %2778 = vmatpush3.msra.mxu0 %v2933_v59  ;;  %2779 = vmatprep.mubr.msk.f32.mxu0 %vm3064_vm3, %v3063_v57 }
 0x2d1   :  { %2787 = vmatprep.subr.mxu0 %v3063_v57  ;;  %2775 = vmatmul.mubr.msk.f32.vlgmr.msra.gmra.mrb[24].mxu1 %vm854_vm4, %v1679_v12 }
 0x2d2   :  { %2783 = vmatpush3.msra.mxu1 %v2934_v28  ;;  %v1889_v41 = vpop.trf.xlu0  ;;  %2784 = vmatprep.mubr.msk.f32.mxu1 %vm3064_vm3, %v3063_v57 }
 0x2d3   :  { %2780 = vmatmul.mubr.msk.f32.vlgmr.msra.gmra.mrb[24].mxu0 %vm854_vm4, %v1784_v34  ;;  %v1994_v60 = vpop.trf.xlu1  ;;  %2792 = vmatprep.subr.mxu1 %v3063_v57 }
 0x2d4   :  { %2788 = vmatpush3.msra.mxu0 %v2935_v6  ;;  %2789 = vmatprep.mubr.msk.f32.mxu0 %vm3064_vm3, %v3063_v57 }
 0x2d5   :  { %2797 = vmatprep.subr.mxu0 %v3063_v57  ;;  %2785 = vmatmul.mubr.msk.f32.vlgmr.msra.gmra.mrb[26].mxu1 %vm854_vm4, %v1889_v41 }
 0x2d6   :  { %2793 = vmatpush3.msra.mxu1 %v2936_v43  ;;  %v2099_v25 = vpop.trf.xlu0  ;;  %2794 = vmatprep.mubr.msk.f32.mxu1 %vm3064_vm3, %v3063_v57 }
 0x2d7   :  { %2790 = vmatmul.mubr.msk.f32.vlgmr.msra.gmra.mrb[26].mxu0 %vm854_vm4, %v1994_v60  ;;  %v2204_v55 = vpop.trf.xlu1  ;;  %2802 = vmatprep.subr.mxu1 %v3063_v57 }
 0x2d8   :  { %2798 = vmatpush3.msra.mxu0 %v2937_v32  ;;  %2799 = vmatprep.mubr.msk.f32.mxu0 %vm3064_vm3, %v3063_v57 }
 0x2d9   :  { %2807 = vmatprep.subr.mxu0 %v3063_v57  ;;  %2795 = vmatmul.mubr.msk.f32.vlgmr.msra.gmra.mrb[28].mxu1 %vm854_vm4, %v2099_v25 }
 0x2da   :  { %2803 = vmatpush3.msra.mxu1 %v2938_v48  ;;  %2804 = vmatprep.mubr.msk.f32.mxu1 %vm3064_vm3, %v3063_v57  ;;  %v2309_v45 = vpop.trf.xlu0 }
 0x2db   :  { %2800 = vmatmul.mubr.msk.f32.vlgmr.msra.gmra.mrb[28].mxu0 %vm854_vm4, %v2204_v55  ;;  %v2414_v0 = vpop.trf.xlu1 }
 0x2dc   :  { %2808 = vmatpush3.msra.mxu0 %v2939_v46  ;;  %2809 = vmatprep.mubr.msk.f32.mxu0 %vm3064_vm3, %v3063_v57 }
 0x2dd   :  { %2805 = vmatmul.mubr.msk.f32.vlgmr.msra.gmra.mrb[30].mxu1 %vm854_vm4, %v2309_v45 }
 0x2df   :  { %2810 = vmatmul.mubr.msk.f32.vlgmr.msra.gmra.mrb[30].mxu0 %vm854_vm4, %v2414_v0 }
 0x2e0   :  { %3017 = shalt.err (!%p3014_p0)
}
 0x2e1   :  { %s3018_s5 = scalar_lea.hbm %s3523_s4, 2048 }
 0x2e2   :  { %p3019_p1 = scmp.ne.s32.totalorder %s3523_s4, %s3018_s5  ;;  %p3022_p2 = scmp.lt.u32.totalorder %s3018_s5, %s3523_s4 }
 0x2e4   :  { %p3024_p3 = pnand %p3022_p2, %p3019_p1 }
 0x2e6   :  { %3027 = shalt.err (!%p3024_p3)
}
 0x2e7   :  { %2543 = dma.vmem_to_hbm [thread:$0]  %s2538_s25, 2048, %s3523_s4, [#allocation10], %s3060_s27, %s3060_s27, %s3061_s28   ;;  %vm2503_vm5 = vcmask 257024  }
 0x2e8   :  { %s3066_s4 = smov [#allocation8]  }
 0x2e9   :  { %s2525_s27 = sshll.u32 %s3066_s4, 4  ;;  %s2526_s27 = int_to_ptr.vmem [resolvable:$true] %s2525_s27 }
 0x2ea   :  { %s3028_s28 = scalar_lea.vmem %s2526_s27, 1024  ;;  %p3033_p5 = scmp.lt.s32.totalorder %s2526_s27, %s2526_s27 }
 0x2eb   :  { %p3029_p4 = scmp.ne.s32.totalorder %s2526_s27, %s3028_s28  ;;  %p3034_p6 = scmp.lt.s32.totalorder %s3028_s28, %s3028_s28 }
 0x2ed   :  { %p3035_p7 = por %p3034_p6, %p3033_p5 }
 0x2ef   :  { %p3036_p8 = pnand %p3035_p7, %p3029_p4 }
 0x38e   :  { %v924_v57 = vpop.f32.mrb[16].mxu1 }
 0x38f   :  { %2504 = vst.msk [vmem:[#allocation8] sm:$0xf] %vm2503_vm5, %v924_v57  ;;  %v2736_v53 = vpop.f32.mrb[17].mxu1 }
 0x396   :  { %v1029_v1 = vpop.f32.mrb[16].mxu0 }
 0x397   :  { %2505 = vst.msk [vmem:[#allocation8 + $0x4] sm:$0xf] %vm2503_vm5, %v1029_v1  ;;  %v2741_v39 = vpop.f32.mrb[17].mxu0  ;;  %v1134_v47 = vpop.f32.mrb[18].mxu1 }
 0x398   :  { %2506 = vst.msk [vmem:[#allocation8 + $0x8] sm:$0xf] %vm2503_vm5, %v1134_v47  ;;  %v2746_v26 = vpop.f32.mrb[19].mxu1 }
 0x39a   :  { %v1239_v49 = vpop.f32.mrb[18].mxu0 }
 0x39b   :  { %2507 = vst.msk [vmem:[#allocation8 + $0xc] sm:$0xf] %vm2503_vm5, %v1239_v49  ;;  %v2751_v51 = vpop.f32.mrb[19].mxu0 }
 0x39c   :  { %v1344_v54 = vpop.f32.mrb[20].mxu1 }
 0x39d   :  { %2508 = vst.msk [vmem:[#allocation8 + $0x10] sm:$0xf] %vm2503_vm5, %v1344_v54  ;;  %v2756_v38 = vpop.f32.mrb[21].mxu1 }
 0x39e   :  { %v1449_v37 = vpop.f32.mrb[20].mxu0 }
 0x39f   :  { %2509 = vst.msk [vmem:[#allocation8 + $0x14] sm:$0xf] %vm2503_vm5, %v1449_v37  ;;  %v2761_v62 = vpop.f32.mrb[21].mxu0 }
 0x3a0   :  { %v1554_v63 = vpop.f32.mrb[22].mxu1 }
 0x3a1   :  { %2510 = vst.msk [vmem:[#allocation8 + $0x18] sm:$0xf] %vm2503_vm5, %v1554_v63  ;;  %v2766_v2 = vpop.f32.mrb[23].mxu1 }
 0x3a2   :  { %v1659_v7 = vpop.f32.mrb[22].mxu0 }
 0x3a3   :  { %2511 = vst.msk [vmem:[#allocation8 + $0x1c] sm:$0xf] %vm2503_vm5, %v1659_v7  ;;  %v2771_v23 = vpop.f32.mrb[23].mxu0 }
 0x3a4   :  { %v1764_v24 = vpop.f32.mrb[24].mxu1 }
 0x3a5   :  { %2512 = vst.msk [vmem:[#allocation8 + $0x20] sm:$0xf] %vm2503_vm5, %v1764_v24  ;;  %v2776_v33 = vpop.f32.mrb[25].mxu1 }
 0x3a6   :  { %v1869_v13 = vpop.f32.mrb[24].mxu0 }
 0x3a7   :  { %2513 = vst.msk [vmem:[#allocation8 + $0x24] sm:$0xf] %vm2503_vm5, %v1869_v13  ;;  %v2781_v58 = vpop.f32.mrb[25].mxu0 }
 0x3a8   :  { %v1974_v19 = vpop.f32.mrb[26].mxu1 }
 0x3a9   :  { %2514 = vst.msk [vmem:[#allocation8 + $0x28] sm:$0xf] %vm2503_vm5, %v1974_v19  ;;  %v2786_v14 = vpop.f32.mrb[27].mxu1 }
 0x3aa   :  { %v2079_v4 = vpop.f32.mrb[26].mxu0 }
 0x3ab   :  { %2515 = vst.msk [vmem:[#allocation8 + $0x2c] sm:$0xf] %vm2503_vm5, %v2079_v4  ;;  %v2791_v16 = vpop.f32.mrb[27].mxu0 }
 0x3ac   :  { %v2184_v52 = vpop.f32.mrb[28].mxu1 }
 0x3ad   :  { %2516 = vst.msk [vmem:[#allocation8 + $0x30] sm:$0xf] %vm2503_vm5, %v2184_v52  ;;  %v2796_v20 = vpop.f32.mrb[29].mxu1 }
 0x3ae   :  { %v2289_v17 = vpop.f32.mrb[28].mxu0 }
 0x3af   :  { %2517 = vst.msk [vmem:[#allocation8 + $0x34] sm:$0xf] %vm2503_vm5, %v2289_v17  ;;  %v2801_v36 = vpop.f32.mrb[29].mxu0 }
 0x3b0   :  { %v2394_v27 = vpop.f32.mrb[30].mxu1 }
 0x3b1   :  { %2518 = vst.msk [vmem:[#allocation8 + $0x38] sm:$0xf] %vm2503_vm5, %v2394_v27  ;;  %v2806_v3 = vpop.f32.mrb[31].mxu1 }
 0x3b2   :  { %v2499_v5 = vpop.f32.mrb[30].mxu0 }
 0x3b3   :  { %2519 = vst.msk [vmem:[#allocation8 + $0x3c] sm:$0xf] %vm2503_vm5, %v2499_v5  ;;  %v2811_v40 = vpop.f32.mrb[31].mxu0 }
 0x3b4   :  { %3039 = shalt.err (!%p3036_p8)
}
 0x3b5   :  { %s3040_s13 = scalar_lea.hbm %s3522_s3, 1024 }
 0x3b6   :  { %p3041_p9 = scmp.ne.s32.totalorder %s3522_s3, %s3040_s13  ;;  %p3044_p10 = scmp.lt.u32.totalorder %s3040_s13, %s3522_s3 }
 0x3b8   :  { %p3046_p11 = pnand %p3044_p10, %p3041_p9 }
 0x3ba   :  { %3049 = shalt.err (!%p3046_p11)
}
 0x3bb   :  { %s3067_s19 = smov 64   ;;  %s3068_s20 = smov 4  }
 0x3bc   :  { %2531 = dma.vmem_to_hbm [thread:$0]  %s2526_s27, 1024, %s3522_s3, [#allocation4], %s3067_s19, %s3067_s19, %s3068_s20  }
 0x3bd   :  { %3054 = dma.done.wait [#allocation4], 1024  }
 0x3be   :  { %3055 = vsyncadd [#allocation4], 4294966272 }
 0x3bf   :  { %3056 = dma.done.wait [#allocation10], 2048  }
 0x3c0   :  { %3057 = vsyncadd [#allocation10], 4294965248 }
 0x3c1   :  { %2550 = vsyncpa [#allocation3], 1 }
 0x3c2   :  { %2551 = vsyncpa [#allocation6], 1 }
 0x3c3   :  { %2552 = vsyncpa [#allocation4], 1 }
 0x3c4   :  { %2553 = vsyncpa [#allocation10], 1 }

</bundles_post_ra>
